<compile_context>
chip_gen: v7x
topology: tpu7x:2x2x1
jax: 0.10.0
libtpu: 0.0.40
codegen_flags: <defaults>
</compile_context>

<pallas_src>
import functools

import jax
import jax.numpy as jnp
from jax.experimental import pallas as pl
from jax.experimental.pallas import tpu as pltpu

MAX_DISPARITY = 256.0   # module default max_disparity=256
# Normalize(mean=0.5, std=0.5)  ==  x * 2 - 1  (folded below)


def _preset_kernel(params_ref, img_ref, disp_ref, mask_ref, img_out_ref, mask_out_ref):
    """grid = (pair_index, h_tile). params_ref (SMEM, (2,4) f32):
    [brightness, contrast, gamma, gray_mean] per image (asymmetric jitter)."""
    i = pl.program_id(0)
    brightness = params_ref[i, 0]
    contrast = params_ref[i, 1]
    gamma = params_ref[i, 2]
    gray_mean = params_ref[i, 3]    # hoisted per-image grayscale mean (see wrapper)

    x = img_ref[...]                                   # (C, TH, W) float32 in [0, 1]

    # --- AsymmetricColorJitter (brightness, contrast; saturation=hue=0 no-ops) ---
    # brightness: blend(img, 0, b) = b * img, clamped to [0, 1]; the lower clamp is
    # unreachable (x >= 0, b > 0) so only the upper bound is applied.
    x = jnp.minimum(x * brightness, 1.0)
    # contrast: blend(img, mean(grayscale(img)), c), clamped.  The lower bound is
    # merged with the epsilon guard for the log below (1e-12 instead of 0 is a
    # negligible deviation, it only changes exact zeros).
    x = jnp.clip(contrast * x + (1.0 - contrast) * gray_mean, 1e-12, 1.0)

    # --- AsymetricGammaAdjust: img ** gamma (gain=1) ---
    # x in (0, 1], gamma > 0  =>  x**gamma in (0, 1], so no extra clamp is needed.
    # Plain f32 log/exp: 2 transcendentals/element ride the EUP slot, which has
    # ample slack in this HBM-bound kernel on every generation.
    x = jnp.exp(gamma * jnp.log(x))

    # --- ConvertImageDtype(float32): no-op (already float32 in [0,1]) ---
    # --- Normalize(mean=0.5, std=0.5) ---
    img_out_ref[...] = x * 2.0 - 1.0

    # --- MakeValidDisparityMask(max_disparity): valid & (disp < max_disparity) ---
    # Disparity itself is passed through unchanged, so it is not written back here.
    d = disp_ref[...]                                  # (TH, W) float32
    mask_out_ref[...] = ((mask_ref[...] != 0) & (d < MAX_DISPARITY)).astype(jnp.uint8)


def _vmem_budget_bytes():
    """Per-generation VMEM budget: 3/4 of the TensorCore's VMEM (128 MiB on
    v5e/v6e -> 96 MiB, 64 MiB on v7x -> 48 MiB).  Falls back to a v7x-safe
    48 MiB if the hardware query is unavailable (e.g. off-TPU tracing)."""
    try:
        cap = pltpu.get_tpu_info().vmem_capacity_bytes
    except Exception:
        cap = 64 * 1024 * 1024
    return (3 * int(cap)) // 4


def _pick_tile_h(h, w, c, budget_bytes):
    """Largest legal H-tile whose per-grid-step VMEM footprint fits the budget.

    Per-step footprint estimate (bytes per tile row):
      double-buffered pipelined blocks: 2 * (img_in 4c + img_out 4c + disp 4 +
      mask_in 1 + mask_out 1)  +  ~4 tile-sized f32 image temporaries (16c)
    Legal tiles: TH == H (full dim) or a multiple of 32 dividing H (uint8 mask
    sublane tiling)."""
    per_row = w * (2 * (8 * c + 6) + 16 * c)
    max_th = max(budget_bytes // per_row, 1)
    if h <= max_th:
        return h                       # full-image tile: fewest grid steps
    best = None
    for th in range(32, min(h, max_th) + 1, 32):
        if h % th == 0:
            best = th
    if best is not None:
        return best
    # Fallback: smallest multiple-of-32 divisor (may exceed budget; vmem_limit
    # below still caps the compiler), else the full dimension.
    for th in range(32, h + 1, 32):
        if h % th == 0:
            return th
    return h


def stereo_train_preset(images, disparities, masks, jitter_params, *,
                        do_flip, tile_h=None, gray_mean_row_stride=2,
                        vmem_budget_bytes=None):
    """images: (2, C, H, W) f32 in [0,1]; disparities: (2, 1, H, W) f32;
    masks: (2, 1, H, W) uint8 (nonzero == valid).

    jitter_params: (2, 3) f32 = [brightness, contrast, gamma] per image (asymmetric).
    do_flip: static Python bool (RandomHorizontalFlip coin, drawn on host).
    gray_mean_row_stride: row subsampling for the contrast-blend grayscale mean
      (augmentation statistic only; 1 == exact torchvision reference).
    """
    n, c, h, w = images.shape
    assert n == 2 and c == 3
    if w % 128 != 0:
        raise ValueError(
            f"W={w} must be a multiple of 128 (lane-dense stores); pad/crop the width.")
    if vmem_budget_bytes is None:
        vmem_budget_bytes = _vmem_budget_bytes()
    if tile_h is None:
        tile_h = _pick_tile_h(h, w, c, vmem_budget_bytes)
    assert h % tile_h == 0, (h, tile_h)

    # Hoist the per-image grayscale mean of the brightness-adjusted image (needed by
    # the contrast blend) so the kernel can tile over H.  Row-subsampled, and kept
    # as a single fused read-only XLA reduction (no (2,3,H,W) intermediate).
    brightness = jitter_params[:, 0]
    xs = images[:, :, ::gray_mean_row_stride, :]
    xb = jnp.clip(xs * brightness[:, None, None, None], 0.0, 1.0)
    gray = 0.2989 * xb[:, 0] + 0.587 * xb[:, 1] + 0.114 * xb[:, 2]
    gray_mean = jnp.mean(gray, axis=(-2, -1))
    params = jnp.concatenate([jitter_params, gray_mean[:, None]], axis=-1)
    params = params.astype(jnp.float32)                   # (2, 4) -> SMEM

    grid = (2, h // tile_h)

    in_img_spec = pl.BlockSpec((None, c, tile_h, w), lambda i, hb: (i, 0, hb, 0))
    in_plane_spec = pl.BlockSpec((None, None, tile_h, w), lambda i, hb: (i, 0, hb, 0))

    # RandomHorizontalFlip: the L/R swap half of the flip is folded into the output
    # index_map (free); the W reverse stays as XLA glue below.
    if do_flip:
        out_map = lambda i, hb: (1 - i, 0, hb, 0)
    else:
        out_map = lambda i, hb: (i, 0, hb, 0)
    out_img_spec = pl.BlockSpec((None, c, tile_h, w), out_map)
    out_plane_spec = pl.BlockSpec((None, None, tile_h, w), out_map)

    n_px = 2 * h * w
    cost = pl.CostEstimate(
        flops=int(10 * c * n_px),                 # elementwise VPU work (approx)
        transcendentals=int(2 * c * n_px),        # log + exp per channel element
        bytes_accessed=int(n_px * (2 * c * 4 + 4 + 2)),  # img in/out f32, disp f32, mask u8 in/out
    )

    out_img, out_mask_u8 = pl.pallas_call(
        _preset_kernel,
        out_shape=(
            jax.ShapeDtypeStruct((2, c, h, w), jnp.float32),
            jax.ShapeDtypeStruct((2, 1, h, w), jnp.uint8),
        ),
        grid_spec=pltpu.PrefetchScalarGridSpec(
            num_scalar_prefetch=0,
            grid=grid,
            in_specs=[
                pl.BlockSpec(memory_space=pltpu.MemorySpace.SMEM),  # jitter params (2,4)
                in_img_spec,      # images
                in_plane_spec,    # disparities (read only, for the validity mask)
                in_plane_spec,    # input validity masks (uint8)
            ],
            out_specs=[out_img_spec, out_plane_spec],
        ),
        compiler_params=pltpu.CompilerParams(
            # TODO(synk): mark the pair axis CORE_PARALLEL on v7x (2 TCs) once that
            #             semantic is safe across generations; "parallel" lets the
            #             runtime split either axis and is a no-op on v5e/v6e.
            dimension_semantics=("parallel", "parallel"),
            vmem_limit_bytes=int(vmem_budget_bytes),
        ),
        cost_estimate=cost,
    )(params, images, disparities, masks)

    # Disparity is unchanged by the elementwise pipeline: return the input directly
    # (no kernel writeback).
    out_disp = disparities

    # --- RandomHorizontalFlip(p=0.5): the W (lane) reverse, XLA glue on flip batches.
    # The L/R swap was already done by the kernel's output index_map above.
    # TODO(synk): fold this lane reverse into the kernel (XLU permute) once a
    #             reliable lax.rev lowering on the lane axis is available in Mosaic.
    if do_flip:
        out_img = jnp.flip(out_img, axis=-1)
        out_mask_u8 = jnp.flip(out_mask_u8, axis=-1)
        out_disp = jnp.flip(out_disp, axis=-1)[::-1]      # flip W + swap L/R

    # ValidateModelInput: shape/dtype checks only, no compute.  Return a bool mask.
    valid_mask = out_mask_u8[:, 0].astype(jnp.bool_)      # (2, H, W)
    return out_img, out_disp, valid_mask


# TODO(synk): T.Resize / RandomSpatialShift / RandomRescaleAndCrop need bilinear
#             resampling; they are skipped here (input already at crop size, scale=1).
# TODO(synk): RandomOcclusion / RandomErase have p=0.0 in the preset defaults -> no-ops.


def _reference_no_flip(images, disparities, masks, jitter_params):
    """Pure-JAX reference of the elementwise pipeline (no flip, exact gray mean)."""
    b = jitter_params[:, 0][:, None, None, None]
    ct = jitter_params[:, 1][:, None, None, None]
    g = jitter_params[:, 2][:, None, None, None]
    x = jnp.clip(images * b, 0.0, 1.0)
    gray = 0.2989 * x[:, 0] + 0.587 * x[:, 1] + 0.114 * x[:, 2]
    gm = jnp.mean(gray, axis=(-2, -1))[:, None, None, None]
    x = jnp.clip(ct * x + (1.0 - ct) * gm, 0.0, 1.0)
    x = jnp.power(x, g)
    img = x * 2.0 - 1.0
    valid = (masks[:, 0] != 0) & (disparities[:, 0] < MAX_DISPARITY)
    return img, disparities, valid


if __name__ == "__main__":
    C, H, W = 3, 64, 256        # small crop; W a multiple of 128 (lane-dense stores)

    key = jax.random.PRNGKey(0)
    k_img, k_disp, k_mask, k_b, k_c, k_g = jax.random.split(key, 6)

    # Stereo pair, channels-first, float32 in [0, 1] (post-ToTensor).
    images = jax.random.uniform(k_img, (2, C, H, W), dtype=jnp.float32)
    # Disparities in [0, 400): some pixels exceed max_disparity=256.
    disparities = jax.random.uniform(k_disp, (2, 1, H, W), dtype=jnp.float32) * 400.0
    # Input validity masks, uint8 (nonzero == valid).
    masks = (jax.random.uniform(k_mask, (2, 1, H, W)) > 0.1).astype(jnp.uint8)

    # Deterministic "random" augmentation parameters (asymmetric across left/right).
    brightness = jax.random.uniform(k_b, (2,), minval=0.8, maxval=1.2)
    contrast = jax.random.uniform(k_c, (2,), minval=0.8, maxval=1.2)
    gamma = jax.random.uniform(k_g, (2,), minval=0.8, maxval=1.2)
    jitter_params = jnp.stack([brightness, contrast, gamma], axis=-1).astype(jnp.float32)

    # --- no-flip batch: check against the pure-JAX reference (exact gray mean) ---
    fn_noflip = jax.jit(functools.partial(
        stereo_train_preset, do_flip=False, gray_mean_row_stride=1))
    out_img, out_disp, out_valid = fn_noflip(images, disparities, masks, jitter_params)
    jax.block_until_ready((out_img, out_disp, out_valid))
    ref_img, ref_disp, ref_valid = _reference_no_flip(images, disparities, masks, jitter_params)
    assert out_img.shape == (2, C, H, W) and out_img.dtype == jnp.float32
    assert out_disp.shape == (2, 1, H, W) and out_disp.dtype == jnp.float32
    assert out_valid.shape == (2, H, W) and out_valid.dtype == jnp.bool_
    assert float(jnp.max(jnp.abs(out_img - ref_img))) < 2e-3
    assert bool(jnp.all(out_valid == ref_valid))
    assert bool(jnp.all(out_disp == ref_disp))

    # --- flip batch: shape/dtype + flip-consistency checks ---
    fn_flip = jax.jit(functools.partial(stereo_train_preset, do_flip=True))
    f_img, f_disp, f_valid = fn_flip(images, disparities, masks, jitter_params)
    jax.block_until_ready((f_img, f_disp, f_valid))
    assert f_img.shape == (2, C, H, W) and f_img.dtype == jnp.float32
    assert f_disp.shape == (2, 1, H, W) and f_disp.dtype == jnp.float32
    assert f_valid.shape == (2, H, W) and f_valid.dtype == jnp.bool_
    # flipped disparity == hflip + L/R swap of the input disparity
    assert bool(jnp.all(f_disp == jnp.flip(disparities, axis=-1)[::-1]))

    print("KERNEL_OK")
</pallas_src>

<mosaic_0001>
module attributes {stable_mosaic.version = 11 : i64} {
  func.func @_preset_kernel(%arg0: i32, %arg1: i32, %arg2: memref<2x4xf32, #tpu.memory_space<smem>>, %arg3: memref<1x3x64x256xf32, #tpu.memory_space<vmem>>, %arg4: memref<1x1x64x256xf32, #tpu.memory_space<vmem>>, %arg5: memref<1x1x64x256xi8, #tpu.memory_space<vmem>>, %arg6: memref<1x3x64x256xf32, #tpu.memory_space<vmem>>, %arg7: memref<1x1x64x256xi8, #tpu.memory_space<vmem>>) attributes {dimension_semantics = [#tpu.dimension_semantics<parallel>, #tpu.dimension_semantics<parallel>], iteration_bounds = array<i64: 2, 1>, scalar_prefetch = 0 : i64, scratch_operands = 0 : i64, tpu.core_type = #tpu.core_type<tc>, window_params = [{transform_indices = @transform_0, window_bounds = array<i64: 2, 4>}, {transform_indices = @transform_1, window_bounds = array<i64: 1, 3, 64, 256>}, {transform_indices = @transform_2, window_bounds = array<i64: 1, 1, 64, 256>}, {transform_indices = @transform_3, window_bounds = array<i64: 1, 1, 64, 256>}, {transform_indices = @transform_4, window_bounds = array<i64: 1, 3, 64, 256>}, {transform_indices = @transform_5, window_bounds = array<i64: 1, 1, 64, 256>}]} {
    %0 = arith.index_cast %arg0 : i32 to index
    %c0 = arith.constant 0 : index
    %1 = memref.load %arg2[%0, %c0] : memref<2x4xf32, #tpu.memory_space<smem>>
    %2 = arith.index_cast %arg0 : i32 to index
    %c1 = arith.constant 1 : index
    %3 = memref.load %arg2[%2, %c1] : memref<2x4xf32, #tpu.memory_space<smem>>
    %4 = arith.index_cast %arg0 : i32 to index
    %c2 = arith.constant 2 : index
    %5 = memref.load %arg2[%4, %c2] : memref<2x4xf32, #tpu.memory_space<smem>>
    %6 = arith.index_cast %arg0 : i32 to index
    %c3 = arith.constant 3 : index
    %7 = memref.load %arg2[%6, %c3] : memref<2x4xf32, #tpu.memory_space<smem>>
    %c0_0 = arith.constant 0 : index
    %c0_1 = arith.constant 0 : index
    %c0_2 = arith.constant 0 : index
    %c0_3 = arith.constant 0 : index
    %8 = vector.load %arg3[%c0_0, %c0_1, %c0_2, %c0_3] : memref<1x3x64x256xf32, #tpu.memory_space<vmem>>, vector<1x3x64x256xf32>
    %9 = vector.shape_cast %8 : vector<1x3x64x256xf32> to vector<3x64x256xf32>
    %10 = vector.broadcast %1 : f32 to vector<3x64x256xf32>
    %11 = arith.mulf %9, %10 : vector<3x64x256xf32>
    %cst = arith.constant 1.000000e+00 : f32
    %12 = vector.broadcast %cst : f32 to vector<3x64x256xf32>
    %13 = arith.minimumf %11, %12 : vector<3x64x256xf32>
    %14 = vector.broadcast %3 : f32 to vector<3x64x256xf32>
    %15 = arith.mulf %14, %13 : vector<3x64x256xf32>
    %cst_4 = arith.constant 1.000000e+00 : f32
    %16 = arith.subf %cst_4, %3 : f32
    %17 = arith.mulf %16, %7 : f32
    %18 = vector.broadcast %17 : f32 to vector<3x64x256xf32>
    %19 = arith.addf %15, %18 : vector<3x64x256xf32>
    %cst_5 = arith.constant 9.99999996E-13 : f32
    %cst_6 = arith.constant 1.000000e+00 : f32
    %20 = vector.broadcast %cst_5 : f32 to vector<3x64x256xf32>
    %21 = arith.maximumf %20, %19 : vector<3x64x256xf32>
    %22 = vector.broadcast %cst_6 : f32 to vector<3x64x256xf32>
    %23 = arith.minimumf %22, %21 : vector<3x64x256xf32>
    %24 = math.log %23 : vector<3x64x256xf32>
    %25 = vector.broadcast %5 : f32 to vector<3x64x256xf32>
    %26 = arith.mulf %25, %24 : vector<3x64x256xf32>
    %27 = math.exp %26 : vector<3x64x256xf32>
    %cst_7 = arith.constant 2.000000e+00 : f32
    %28 = vector.broadcast %cst_7 : f32 to vector<3x64x256xf32>
    %29 = arith.mulf %27, %28 : vector<3x64x256xf32>
    %cst_8 = arith.constant 1.000000e+00 : f32
    %30 = vector.broadcast %cst_8 : f32 to vector<3x64x256xf32>
    %31 = arith.subf %29, %30 : vector<3x64x256xf32>
    %c0_9 = arith.constant 0 : index
    %c0_10 = arith.constant 0 : index
    %c0_11 = arith.constant 0 : index
    %c0_12 = arith.constant 0 : index
    %32 = vector.load %arg6[%c0_9, %c0_10, %c0_11, %c0_12] : memref<1x3x64x256xf32, #tpu.memory_space<vmem>>, vector<1x3x64x256xf32>
    %33 = vector.shape_cast %32 : vector<1x3x64x256xf32> to vector<3x64x256xf32>
    %34 = vector.shape_cast %31 : vector<3x64x256xf32> to vector<1x3x64x256xf32>
    tpu.vector_store %arg6[%c0_9, %c0_10, %c0_11, %c0_12], %34 {strides = array<i32>} : memref<1x3x64x256xf32, #tpu.memory_space<vmem>>, vector<1x3x64x256xf32>,
    %c0_13 = arith.constant 0 : index
    %c0_14 = arith.constant 0 : index
    %c0_15 = arith.constant 0 : index
    %c0_16 = arith.constant 0 : index
    %35 = vector.load %arg4[%c0_13, %c0_14, %c0_15, %c0_16] : memref<1x1x64x256xf32, #tpu.memory_space<vmem>>, vector<1x1x64x256xf32>
    %36 = vector.shape_cast %35 : vector<1x1x64x256xf32> to vector<64x256xf32>
    %c0_17 = arith.constant 0 : index
    %c0_18 = arith.constant 0 : index
    %c0_19 = arith.constant 0 : index
    %c0_20 = arith.constant 0 : index
    %37 = vector.load %arg5[%c0_17, %c0_18, %c0_19, %c0_20] : memref<1x1x64x256xi8, #tpu.memory_space<vmem>>, vector<1x1x64x256xi8>
    %38 = vector.shape_cast %37 : vector<1x1x64x256xi8> to vector<64x256xi8>
    %c0_i8 = arith.constant 0 : i8
    %39 = vector.broadcast %c0_i8 : i8 to vector<64x256xi8>
    %40 = arith.cmpi ne, %38, %39 : vector<64x256xi8>
    %cst_21 = arith.constant 2.560000e+02 : f32
    %41 = vector.broadcast %cst_21 : f32 to vector<64x256xf32>
    %42 = arith.cmpf olt, %36, %41 : vector<64x256xf32>
    %43 = arith.andi %40, %42 : vector<64x256xi1>
    %44 = arith.extui %43 : vector<64x256xi1> to vector<64x256xi8>
    %c0_22 = arith.constant 0 : index
    %c0_23 = arith.constant 0 : index
    %c0_24 = arith.constant 0 : index
    %c0_25 = arith.constant 0 : index
    %45 = vector.load %arg7[%c0_22, %c0_23, %c0_24, %c0_25] : memref<1x1x64x256xi8, #tpu.memory_space<vmem>>, vector<1x1x64x256xi8>
    %46 = vector.shape_cast %45 : vector<1x1x64x256xi8> to vector<64x256xi8>
    %47 = vector.shape_cast %44 : vector<64x256xi8> to vector<1x1x64x256xi8>
    tpu.vector_store %arg7[%c0_22, %c0_23, %c0_24, %c0_25], %47 {strides = array<i32>} : memref<1x1x64x256xi8, #tpu.memory_space<vmem>>, vector<1x1x64x256xi8>,
    return
  }
  func.func @transform_0(%arg0: i32, %arg1: i32) -> (i32, i32) {
    %c0_i32 = arith.constant 0 : i32
    %c0_i32_0 = arith.constant 0 : i32
    %c0_i32_1 = arith.constant 0 : i32
    return %c0_i32, %c0_i32_0 : i32, i32
  }
  func.func @transform_1(%arg0: i32, %arg1: i32) -> (i32, i32, i32, i32) {
    %c0_i32 = arith.constant 0 : i32
    %c0_i32_0 = arith.constant 0 : i32
    %c0_i32_1 = arith.constant 0 : i32
    return %arg0, %c0_i32, %arg1, %c0_i32_0 : i32, i32, i32, i32
  }
  func.func @transform_2(%arg0: i32, %arg1: i32) -> (i32, i32, i32, i32) {
    %c0_i32 = arith.constant 0 : i32
    %c0_i32_0 = arith.constant 0 : i32
    %c0_i32_1 = arith.constant 0 : i32
    return %arg0, %c0_i32, %arg1, %c0_i32_0 : i32, i32, i32, i32
  }
  func.func @transform_3(%arg0: i32, %arg1: i32) -> (i32, i32, i32, i32) {
    %c0_i32 = arith.constant 0 : i32
    %c0_i32_0 = arith.constant 0 : i32
    %c0_i32_1 = arith.constant 0 : i32
    return %arg0, %c0_i32, %arg1, %c0_i32_0 : i32, i32, i32, i32
  }
  func.func @transform_4(%arg0: i32, %arg1: i32) -> (i32, i32, i32, i32) {
    %c0_i32 = arith.constant 0 : i32
    %c0_i32_0 = arith.constant 0 : i32
    %c0_i32_1 = arith.constant 0 : i32
    return %arg0, %c0_i32, %arg1, %c0_i32_0 : i32, i32, i32, i32
  }
  func.func @transform_5(%arg0: i32, %arg1: i32) -> (i32, i32, i32, i32) {
    %c0_i32 = arith.constant 0 : i32
    %c0_i32_0 = arith.constant 0 : i32
    %c0_i32_1 = arith.constant 0 : i32
    return %arg0, %c0_i32, %arg1, %c0_i32_0 : i32, i32, i32, i32
  }
}

</mosaic_0001>

<bundles_post_ra>
// kernel: stereo_train_preset.1
= control target key start
LH: loop header
LB: loop body
LE: loop exit
PB: predicated region body
PF: predicated region fallthrough
CT: control target
= control target key end

     0   :  { %11 = vsyncpa [#allocation4], 0  ;;  %s2398_s0 = inlined_call_operand.vmem [shape: f32[2,4], index: 0, kind: input, shape index: {}]   ;;  %s2399_s1 = inlined_call_operand.vmem [shape: f32[2,3,64,256], index: 1, kind: input, shape index: {}]   ;;  %s2400_s2 = inlined_call_operand.vmem [shape: f32[2,1,64,256], index: 2, kind: input, shape index: {}]   ;;  %s2401_s3 = inlined_call_operand.vmem [shape: u8[2,1,64,256], index: 3, kind: input, shape index: {}]   ;;  %s2402_s4 = inlined_call_operand.hbm [shape: f32[2,3,64,256], index: 4, kind: output, shape index: {0}]   ;;  %s2403_s5 = inlined_call_operand.vmem [shape: u8[2,1,64,256], index: 5, kind: output, shape index: {1}]  }
   0x1   :  { %12 = vsyncpa [#allocation3], 0 }
   0x2   :  { %14 = vsyncpa [#allocation3 + $0x1], 0  ;;  %s1851_s18 = smov 0   ;;  %s1853_s19 = smov 0  }
   0x3   :  { %s1855_s20 = smov 0   ;;  %s1857_s21 = smov 0  }
   0x4   :  { %s1859_s22 = smov 0   ;;  %s1861_s23 = smov 0  }
   0x5 LB: > { %s1384_s24 = sadd.s32 4294967295, %s1814_s23   ;;  %s1385_s25 = sadd.s32 4294967294, %s1814_s23   ;;  %s1814_s23 = sphi %s1861_s23, %s20_s23   ;;  %s1810_s22 = sphi %s1859_s22, %s2420_s22   ;;  %s1806_s21 = sphi %s1857_s21, %s2419_s21   ;;  %s1802_s20 = sphi %s1855_s20, %s2418_s20   ;;  %s1798_s19 = sphi %s1853_s19, %s2417_s19   ;;  %s1794_s18 = sphi %s1851_s18, %s2416_s18  }
   0x6   : > { %s32_s26 = sadd.s32 1, %s1810_s22  ;;  %s146_s27 = sadd.s32 1, %s1802_s20 }
   0x7   : > { %p34_p0 = scmp.ge.s32.totalorder %s32_s26, 2  ;;  %p156_p1 = scmp.ne.s32.totalorder %s1802_s20, %s1798_s19 }
   0x8   : > { %p157_p2 = scmp.eq.s32.totalorder %s1384_s24, 1  ;;  %p162_p3 = scmp.ne.s32.totalorder %s1798_s19, %s1794_s18 }
   0x9   : > { %s2422_s26 = smov (%p34_p0, %s32_s26), 0  ;;  %p163_p5 = scmp.eq.s32.totalorder %s1385_s25, 1 }
   0xa   : > { %p1891_p4 = por %p157_p2, %p156_p1  ;;  %s141_s29 = ssub.s32 %s1810_s22, %s2422_s26 }
   0xb   : > { %p1386_p6 = scmp.ge.s32.totalorder %s1814_s23, 1  ;;  %p144_p7 = scmp.eq.s32.totalorder %s141_s29, 0 }
   0xc   : > { %p1898_p8 = por %p163_p5, %p162_p3  ;;  %p198_p9 = scmp.lt.s32.totalorder %s1814_s23, 3 }
   0xd   : > { %s1904_s6 = scalar_select %p144_p7, %s1802_s20, %s146_s27  }
   0xe   : > { %p1906_p10 = pnand %p1386_p6, %p198_p9  ;;  %p1910_p11 = scmp.eq.s32.totalorder %s1384_s24, 0 }
   0xf   : > { %s211_s11 = sshll.u32 %s2398_s0, 4  ;;  %s212_s11 = int_to_ptr.vmem [resolvable:$true] %s211_s11 }
  0x10   : > { %p1462_p12 = pneg %p1906_p10  ;;  %s1717_s12 = scalar_lea.vmem %s212_s11, 32 }
  0x11   : > { %p1718_p0 = scmp.ne.s32.totalorder %s212_s11, %s1717_s12  ;;  %p1725_p5 = scmp.lt.s32.totalorder %s212_s11, %s212_s11 }
  0x12   : > { %p1463_p13 = pnand %p1910_p11, %p1462_p12  ;;  %p1726_p6 = scmp.lt.s32.totalorder %s1717_s12, %s1717_s12 }
  0x14   : > { %p1719_p1 = pneg %p1463_p13  ;;  %p1727_p7 = por %p1726_p6, %p1725_p5 }
  0x16   : > { %p1720_p2 = pnand %p1719_p1, %p1718_p0 }
  0x18   : > { %p1721_p3 = pneg %p1720_p2 }
  0x1a   : > { %p1728_p9 = pnand %p1727_p7, %p1721_p3 }
  0x1c   : > { %1731 = shalt.err (!%p1728_p9)
}
  0x1d   : > { %s1816_s13 = smov [#allocation2]   ;;  %266 = sbr.rel (%p1906_p10) target bundleno = 244 (0xf4), region = 36 }
  0x1e   : > { %1465 = dma.vmem_to_smem (!%p1463_p13), %s212_s11, 32, %s1816_s13, [#allocation4]  }
  0x24   : > { %1785 = dma.done.wait (%p1910_p11), [#allocation4], 32  }
  0x25   : > { %1787 = vsyncadd (%p1910_p11), [#allocation4], 4294967264 }
  0x26   : > { %272 = sfence }
  0x27   : > { %p331_p12 = scmp.lt.s32.totalorder %s1806_s21, 1  ;;  %s1398_s14 = sshll.u32 %s1806_s21, 7 }
  0x28   : > { %s378_s16 = sld [smem:[#allocation2 + %s1398_s14]]  ;;  %s379_s24 = sadd.s32 1, %s1398_s14 }
  0x29   : > { %s1930_s15 = scalar_select %p331_p12, %s1806_s21, 1 }
  0x2a   : > { %s1933_s25 = sld [smem:[#allocation2 + %s379_s24]]  ;;  %s381_s27 = sadd.s32 2, %s1398_s14 }
  0x2b   : > { %s1454_s17 = smul.u32 384, %s1930_s15  ;;  %s382_s9 = sld [smem:[#allocation2 + %s381_s27]] }
  0x2c   : > { %s383_s10 = sadd.s32 3, %s1398_s14  ;;  %s315_s14 = sand.u32 1, %s1798_s19  }
  0x2d   : > { %s1938_s8 = scalar_lea.vmem %s2399_s1, %s1454_s17  ;;  %s384_s11 = sld [smem:[#allocation2 + %s383_s10]] }
  0x2e   : > { %v385_v0 = vld [vmem:[%s1938_s8] sm:$0xff]  ;;  %v386_v1 = vld [vmem:[%s1938_s8 + $0x8] sm:$0xff]  ;;  %v387_v2 = vld [vmem:[%s1938_s8 + $0x10] sm:$0xff]  ;;  %v1946_v6 = vstv %s378_s16  ;;  %s2036_s16 = smul.u32 384, %s315_s14  ;;  %s1450_s24 = sshll.u32 %s1930_s15, 7 }
  0x2f   : > { %v388_v3 = vld [vmem:[%s1938_s8 + $0x18] sm:$0xff]  ;;  %v389_v4 = vld [vmem:[%s1938_s8 + $0x20] sm:$0xff]  ;;  %v390_v5 = vld [vmem:[%s1938_s8 + $0x28] sm:$0xff]  ;;  %v434_v8 = vmul.f32 %v1946_v6, %v385_v0  ;;  %v435_v9 = vmul.f32 %v1946_v6, %v386_v1  ;;  %v436_v10 = vmul.f32 %v1946_v6, %v387_v2  ;;  %s2232_s29 = scalar_lea.vmem %s2400_s2, %s1450_s24  ;;  %s1451_s7 = sshll.u32 %s1930_s15, 5 }
  0x30   : > { %v391_v7 = vld [vmem:[%s1938_s8 + $0x30] sm:$0xff]  ;;  %v437_v11 = vmul.f32 %v1946_v6, %v388_v3  ;;  %v1954_v12 = vstv %s1933_s25  ;;  %s579_s12 = ssub.f32 1.0, %s1933_s25  ;;  %v438_v13 = vmul.f32 %v1946_v6, %v389_v4  ;;  %v439_v14 = vmul.f32 %v1946_v6, %v390_v5  ;;  %v392_v16 = vld [vmem:[%s1938_s8 + $0x38] sm:$0xff]  ;;  %v393_v25 = vld [vmem:[%s1938_s8 + $0x40] sm:$0xff]  ;;  %s2046_s17 = scalar_lea.vmem [#allocation5], %s2036_s16 }
  0x31   : > { %v440_v15 = vmul.f32 %v1946_v6, %v391_v7  ;;  %v482_v17 = vmin.f32 %v434_v8, 1.0  ;;  %v1961_v18 = vstv %s382_s9  ;;  %v483_v19 = vmin.f32 %v435_v9, 1.0  ;;  %v394_v26 = vld [vmem:[%s1938_s8 + $0x48] sm:$0xff]  ;;  %v395_v39 = vld [vmem:[%s1938_s8 + $0x50] sm:$0xff]  ;;  %v396_v60 = vld [vmem:[%s1938_s8 + $0x58] sm:$0xff]  ;;  %s2243_s10 = scalar_lea.vmem %s2401_s3, %s1451_s7  ;;  %s1455_s15 = smul.u32 6144, %s1806_s21 }
  0x32   : > { %v484_v20 = vmin.f32 %v436_v10, 1.0  ;;  %v485_v21 = vmin.f32 %v437_v11, 1.0  ;;  %v486_v22 = vmin.f32 %v438_v13, 1.0  ;;  %v487_v23 = vmin.f32 %v439_v14, 1.0  ;;  %v397_v1 = vld [vmem:[%s1938_s8 + $0x60] sm:$0xff]  ;;  %v398_v5 = vld [vmem:[%s1938_s8 + $0x68] sm:$0xff] }
  0x33   : > { %v488_v24 = vmin.f32 %v440_v15, 1.0  ;;  %v531_v27 = vmul.f32 %v1954_v12, %v482_v17  ;;  %s580_s13 = smul.f32 %s579_s12, %s384_s11  ;;  %v532_v28 = vmul.f32 %v1954_v12, %v483_v19  ;;  %v441_v30 = vmul.f32 %v1946_v6, %v392_v16  ;;  %s1202_s16 = sshll.u32 %s2046_s17, 4  ;;  %s2347_s16 = int_to_ptr.vmem [resolvable:$true] %s1202_s16 }
  0x34   : > { %v533_v29 = vmul.f32 %v1954_v12, %v484_v20  ;;  %v534_v31 = vmul.f32 %v1954_v12, %v485_v21  ;;  %v535_v32 = vmul.f32 %v1954_v12, %v486_v22  ;;  %v536_v33 = vmul.f32 %v1954_v12, %v487_v23  ;;  %s2345_s27 = scalar_lea.hbm %s2402_s4, %s1455_s15  ;;  %s2352_s21 = scalar_lea.sflag [#allocation3], %s315_s14 }
  0x35   : > { %v537_v34 = vmul.f32 %v1954_v12, %v488_v24  ;;  %v1973_v35 = vstv %s580_s13  ;;  %v489_v36 = vmin.f32 %v441_v30, 1.0  ;;  %v442_v37 = vmul.f32 %v1946_v6, %v393_v25  ;;  %v399_v24 = vld [vmem:[%s1938_s8 + $0x70] sm:$0xff]  ;;  %s2274_s13 = scalar_lea.vmem %s2403_s5, %s1451_s7  ;;  %s1818_s7 = smov [#allocation5]  }
  0x36   : > { %v443_v38 = vmul.f32 %v1946_v6, %v394_v26  ;;  %v582_v40 = vadd.f32 %v1973_v35, %v531_v27  ;;  %v583_v41 = vadd.f32 %v1973_v35, %v532_v28  ;;  %v584_v42 = vadd.f32 %v1973_v35, %v533_v29  ;;  %v400_v28 = vld [vmem:[%s1938_s8 + $0x78] sm:$0xff] }
  0x37   : > { %v585_v43 = vadd.f32 %v1973_v35, %v534_v31  ;;  %v586_v44 = vadd.f32 %v1973_v35, %v535_v32  ;;  %v587_v45 = vadd.f32 %v1973_v35, %v536_v33  ;;  %v588_v46 = vadd.f32 %v1973_v35, %v537_v34  ;;  %v401_v32 = vld [vmem:[%s1938_s8 + $0x80] sm:$0xff] }
  0x38   : > { %v538_v47 = vmul.f32 %v1954_v12, %v489_v36  ;;  %v630_v48 = vmax.f32 %v582_v40, 1e-12  ;;  %v631_v49 = vmax.f32 %v583_v41, 1e-12  ;;  %v632_v50 = vmax.f32 %v584_v42, 1e-12 }
  0x39   : > { %v444_v51 = vmul.f32 %v1946_v6, %v395_v39  ;;  %v633_v52 = vmax.f32 %v585_v43, 1e-12  ;;  %v634_v53 = vmax.f32 %v586_v44, 1e-12  ;;  %v635_v54 = vmax.f32 %v587_v45, 1e-12 }
  0x3a   : > { %v589_v55 = vadd.f32 %v1973_v35, %v538_v47  ;;  %v678_v56 = vmin.f32 %v630_v48, 1.0  ;;  %v679_v57 = vmin.f32 %v631_v49, 1.0  ;;  %v680_v58 = vmin.f32 %v632_v50, 1.0 }
  0x3b   : > { %v636_v59 = vmax.f32 %v588_v46, 1e-12  ;;  %v681_v61 = vmin.f32 %v633_v52, 1.0  ;;  %v682_v62 = vmin.f32 %v634_v53, 1.0  ;;  %v683_v63 = vmin.f32 %v635_v54, 1.0 }
  0x3c   : > { %v637_v0 = vmax.f32 %v589_v55, 1e-12  ;;  %1525 = vlog2.f32 %v678_v56  ;;  %v490_v3 = vmin.f32 %v442_v37, 1.0  ;;  %v491_v4 = vmin.f32 %v443_v38, 1.0 }
  0x3d   : > { %v684_v2 = vmin.f32 %v636_v59, 1.0  ;;  %1527 = vlog2.f32 %v679_v57  ;;  %v492_v8 = vmin.f32 %v444_v51, 1.0  ;;  %v445_v9 = vmul.f32 %v1946_v6, %v396_v60 }
  0x3e   : > { %v685_v7 = vmin.f32 %v637_v0, 1.0  ;;  %1529 = vlog2.f32 %v680_v58  ;;  %v539_v10 = vmul.f32 %v1954_v12, %v490_v3  ;;  %v540_v11 = vmul.f32 %v1954_v12, %v491_v4 }
  0x3f   : > { %v446_v13 = vmul.f32 %v1946_v6, %v397_v1  ;;  %1531 = vlog2.f32 %v681_v61  ;;  %v541_v14 = vmul.f32 %v1954_v12, %v492_v8  ;;  %v493_v15 = vmin.f32 %v445_v9, 1.0 }
  0x40   : > { %v447_v16 = vmul.f32 %v1946_v6, %v398_v5  ;;  %1533 = vlog2.f32 %v682_v62  ;;  %v590_v17 = vadd.f32 %v1973_v35, %v539_v10  ;;  %v591_v19 = vadd.f32 %v1973_v35, %v540_v11 }
  0x41   : > { %v494_v20 = vmin.f32 %v446_v13, 1.0  ;;  %1535 = vlog2.f32 %v683_v63  ;;  %v592_v21 = vadd.f32 %v1973_v35, %v541_v14  ;;  %v542_v22 = vmul.f32 %v1954_v12, %v493_v15 }
  0x42   : > { %v495_v23 = vmin.f32 %v447_v16, 1.0  ;;  %1537 = vlog2.f32 %v684_v2  ;;  %v638_v25 = vmax.f32 %v590_v17, 1e-12  ;;  %v639_v26 = vmax.f32 %v591_v19, 1e-12 }
  0x43   : > { %v543_v27 = vmul.f32 %v1954_v12, %v494_v20  ;;  %1539 = vlog2.f32 %v685_v7  ;;  %v640_v29 = vmax.f32 %v592_v21, 1e-12  ;;  %v593_v30 = vadd.f32 %v1973_v35, %v542_v22 }
  0x44   : > { %v544_v31 = vmul.f32 %v1954_v12, %v495_v23  ;;  %v686_v33 = vmin.f32 %v638_v25, 1.0  ;;  %v687_v34 = vmin.f32 %v639_v26, 1.0  ;;  %v448_v37 = vmul.f32 %v1946_v6, %v399_v24 }
  0x45   : > { %v594_v36 = vadd.f32 %v1973_v35, %v543_v27  ;;  %v688_v38 = vmin.f32 %v640_v29, 1.0  ;;  %v641_v39 = vmax.f32 %v593_v30, 1e-12  ;;  %v2011_v41 = vmul.f32 %v1946_v6, %v400_v28 }
  0x46   : > { %v595_v40 = vadd.f32 %v1973_v35, %v544_v31  ;;  %v1526_v42 = vpop.eup %1525  ;;  %1541 = vlog2.f32 %v686_v33  ;;  %v496_v44 = vmin.f32 %v448_v37, 1.0  ;;  %v2014_v45 = vmul.f32 %v1946_v6, %v401_v32 }
  0x47   : > { %v642_v43 = vmax.f32 %v594_v36, 1e-12  ;;  %v1528_v46 = vpop.eup %1527  ;;  %v727_v47 = vmul.f32 0.6931472, %v1526_v42  ;;  %1543 = vlog2.f32 %v687_v34  ;;  %v689_v48 = vmin.f32 %v641_v39, 1.0 }
  0x48   : > { %v643_v49 = vmax.f32 %v595_v40, 1e-12  ;;  %v1530_v50 = vpop.eup %1529  ;;  %v729_v51 = vmul.f32 0.6931472, %v1528_v46  ;;  %1545 = vlog2.f32 %v688_v38  ;;  %v545_v53 = vmul.f32 %v1954_v12, %v496_v44 }
  0x49   : > { %v690_v52 = vmin.f32 %v642_v43, 1.0  ;;  %v1532_v54 = vpop.eup %1531  ;;  %v823_v55 = vmul.f32 %v1961_v18, %v727_v47  ;;  %v731_v56 = vmul.f32 0.6931472, %v1530_v50  ;;  %1547 = vlog2.f32 %v689_v48 }
  0x4a   : > { %v691_v57 = vmin.f32 %v643_v49, 1.0  ;;  %v1534_v58 = vpop.eup %1533  ;;  %v824_v59 = vmul.f32 %v1961_v18, %v729_v51  ;;  %v733_v60 = vmul.f32 0.6931472, %v1532_v54  ;;  %v596_v61 = vadd.f32 %v1973_v35, %v545_v53 }
  0x4b   : > { %1549 = vlog2.f32 %v690_v52  ;;  %v1536_v62 = vpop.eup %1535  ;;  %v871_v63 = vmul.f32 1.442695, %v823_v55  ;;  %v825_v0 = vmul.f32 %v1961_v18, %v731_v56  ;;  %v735_v1 = vmul.f32 0.6931472, %v1534_v58 }
  0x4c   : > { %1551 = vlog2.f32 %v691_v57  ;;  %v1538_v2 = vpop.eup %1537  ;;  %v873_v3 = vmul.f32 1.442695, %v824_v59  ;;  %v826_v4 = vmul.f32 %v1961_v18, %v733_v60  ;;  %v737_v5 = vmul.f32 0.6931472, %v1536_v62 }
  0x4d   : > { %v644_v7 = vmax.f32 %v596_v61, 1e-12  ;;  %v1540_v8 = vpop.eup %1539  ;;  %1553 = vpow2.f32 %v871_v63  ;;  %v875_v9 = vmul.f32 1.442695, %v825_v0  ;;  %v827_v10 = vmul.f32 %v1961_v18, %v735_v1  ;;  %v402_v61 = vld [vmem:[%s1938_s8 + $0x88] sm:$0xff] }
  0x4e   : > { %v739_v11 = vmul.f32 0.6931472, %v1538_v2  ;;  %1555 = vpow2.f32 %v873_v3  ;;  %v877_v13 = vmul.f32 1.442695, %v826_v4  ;;  %v828_v14 = vmul.f32 %v1961_v18, %v737_v5 }
  0x4f   : > { %v741_v15 = vmul.f32 0.6931472, %v1540_v8  ;;  %1557 = vpow2.f32 %v875_v9  ;;  %v879_v16 = vmul.f32 1.442695, %v827_v10  ;;  %v692_v19 = vmin.f32 %v644_v7, 1.0  ;;  %v403_v7 = vld [vmem:[%s1938_s8 + $0x90] sm:$0xff] }
  0x50   : > { %v829_v17 = vmul.f32 %v1961_v18, %v739_v11  ;;  %v1542_v20 = vpop.eup %1541  ;;  %1559 = vpow2.f32 %v877_v13  ;;  %v881_v21 = vmul.f32 1.442695, %v828_v14  ;;  %v497_v23 = vmin.f32 %v2011_v41, 1.0  ;;  %v404_v13 = vld [vmem:[%s1938_s8 + $0x98] sm:$0xff] }
  0x51   : > { %v830_v22 = vmul.f32 %v1961_v18, %v741_v15  ;;  %v1544_v24 = vpop.eup %1543  ;;  %1561 = vpow2.f32 %v879_v16  ;;  %v743_v26 = vmul.f32 0.6931472, %v1542_v20  ;;  %v498_v27 = vmin.f32 %v2014_v45, 1.0 }
  0x52   : > { %v883_v25 = vmul.f32 1.442695, %v829_v17  ;;  %v1546_v28 = vpop.eup %1545  ;;  %1563 = vpow2.f32 %v881_v21  ;;  %v745_v30 = vmul.f32 0.6931472, %v1544_v24  ;;  %v546_v31 = vmul.f32 %v1954_v12, %v497_v23  ;;  %v405_v24 = vld [vmem:[%s1938_s8 + $0xa0] sm:$0xff] }
  0x53   : > { %v885_v29 = vmul.f32 1.442695, %v830_v22  ;;  %v1548_v32 = vpop.eup %1547  ;;  %v831_v33 = vmul.f32 %v1961_v18, %v743_v26  ;;  %v747_v34 = vmul.f32 0.6931472, %v1546_v28  ;;  %v547_v36 = vmul.f32 %v1954_v12, %v498_v27 }
  0x54   : > { %1565 = vpow2.f32 %v883_v25  ;;  %v832_v38 = vmul.f32 %v1961_v18, %v745_v30  ;;  %v749_v39 = vmul.f32 0.6931472, %v1548_v32  ;;  %v597_v40 = vadd.f32 %v1973_v35, %v546_v31  ;;  %v406_v25 = vld [vmem:[%s1938_s8 + $0xa8] sm:$0xff] }
  0x55   : > { %v1550_v37 = vpop.eup %1549  ;;  %1567 = vpow2.f32 %v885_v29  ;;  %v887_v42 = vmul.f32 1.442695, %v831_v33  ;;  %v833_v43 = vmul.f32 %v1961_v18, %v747_v34  ;;  %v598_v52 = vadd.f32 %v1973_v35, %v547_v36 }
  0x56   : > { %v1552_v41 = vpop.eup %1551  ;;  %v751_v44 = vmul.f32 0.6931472, %v1550_v37  ;;  %1569 = vlog2.f32 %v692_v19  ;;  %v889_v45 = vmul.f32 1.442695, %v832_v38  ;;  %v834_v46 = vmul.f32 %v1961_v18, %v749_v39 }
  0x57   : > { %v753_v47 = vmul.f32 0.6931472, %v1552_v41  ;;  %v645_v48 = vmax.f32 %v597_v40, 1e-12  ;;  %v1554_v49 = vpop.eup %1553  ;;  %1571 = vpow2.f32 %v887_v42  ;;  %v891_v50 = vmul.f32 1.442695, %v833_v43 }
  0x58   : > { %v835_v51 = vmul.f32 %v1961_v18, %v751_v44  ;;  %v1556_v53 = vpop.eup %1555  ;;  %v967_v54 = vmul.f32 2.0, %v1554_v49  ;;  %1573 = vpow2.f32 %v889_v45  ;;  %v893_v55 = vmul.f32 1.442695, %v834_v46 }
  0x59   : > { %v836_v56 = vmul.f32 %v1961_v18, %v753_v47  ;;  %v1558_v57 = vpop.eup %1557  ;;  %v968_v58 = vmul.f32 2.0, %v1556_v53  ;;  %1575 = vpow2.f32 %v891_v50  ;;  %v693_v60 = vmin.f32 %v645_v48, 1.0 }
  0x5a   : > { %v895_v59 = vmul.f32 1.442695, %v835_v51  ;;  %v1560_v62 = vpop.eup %1559  ;;  %v1399_v63 = vadd.f32 -1.0, %v967_v54  ;;  %v969_v0 = vmul.f32 2.0, %v1558_v57  ;;  %1577 = vpow2.f32 %v893_v55 }
  0x5b   : > { %v897_v1 = vmul.f32 1.442695, %v836_v56  ;;  %v1562_v2 = vpop.eup %1561  ;;  %v1400_v3 = vadd.f32 -1.0, %v968_v58  ;;  %v970_v4 = vmul.f32 2.0, %v1560_v62  ;;  %v646_v5 = vmax.f32 %v598_v52, 1e-12 }
  0x5c   : > { %1579 = vpow2.f32 %v895_v59  ;;  %v1564_v8 = vpop.eup %1563  ;;  %1063 = vst [vmem:[%s2046_s17] sm:$0xff] %v1399_v63  ;;  %v1401_v9 = vadd.f32 -1.0, %v969_v0  ;;  %v971_v10 = vmul.f32 2.0, %v1562_v2  ;;  %v451_v11 = vmul.f32 %v1946_v6, %v402_v61  ;;  %v407_v0 = vld [vmem:[%s1938_s8 + $0xb0] sm:$0xff] }
  0x5d   : > { %1581 = vpow2.f32 %v897_v1  ;;  %1064 = vst [vmem:[%s2046_s17 + $0x8] sm:$0xff] %v1400_v3  ;;  %v1402_v15 = vadd.f32 -1.0, %v970_v4  ;;  %v972_v16 = vmul.f32 2.0, %v1564_v8  ;;  %v694_v17 = vmin.f32 %v646_v5, 1.0 }
  0x5e   : > { %v1566_v14 = vpop.eup %1565  ;;  %1583 = vlog2.f32 %v693_v60  ;;  %1065 = vst [vmem:[%s2046_s17 + $0x10] sm:$0xff] %v1401_v9  ;;  %v1403_v20 = vadd.f32 -1.0, %v971_v10  ;;  %v499_v22 = vmin.f32 %v451_v11, 1.0  ;;  %v452_v23 = vmul.f32 %v1946_v6, %v403_v7  ;;  %v408_v10 = vld [vmem:[%s1938_s8 + $0xb8] sm:$0xff]  ;;  %v409_v11 = vld [vmem:[%s1938_s8 + $0xc0] sm:$0xff] }
  0x5f   : > { %v1568_v19 = vpop.eup %1567  ;;  %v973_v21 = vmul.f32 2.0, %v1566_v14  ;;  %1066 = vst [vmem:[%s2046_s17 + $0x18] sm:$0xff] %v1402_v15  ;;  %v1404_v27 = vadd.f32 -1.0, %v972_v16  ;;  %1585 = vlog2.f32 %v694_v17  ;;  %v453_v29 = vmul.f32 %v1946_v6, %v404_v13 }
  0x60   : > { %v1570_v26 = vpop.eup %1569  ;;  %v974_v28 = vmul.f32 2.0, %v1568_v19  ;;  %1067 = vst [vmem:[%s2046_s17 + $0x20] sm:$0xff] %v1403_v20  ;;  %v548_v32 = vmul.f32 %v1954_v12, %v499_v22  ;;  %v500_v33 = vmin.f32 %v452_v23, 1.0  ;;  %v454_v38 = vmul.f32 %v1946_v6, %v405_v24 }
  0x61   : > { %v1405_v30 = vadd.f32 -1.0, %v973_v21  ;;  %v755_v31 = vmul.f32 0.6931472, %v1570_v26  ;;  %v1572_v34 = vpop.eup %1571  ;;  %1068 = vst [vmem:[%s2046_s17 + $0x28] sm:$0xff] %v1404_v27  ;;  %v501_v37 = vmin.f32 %v453_v29, 1.0  ;;  %v455_v39 = vmul.f32 %v1946_v6, %v406_v25  ;;  %v410_v26 = vld [vmem:[%s1938_s8 + $0xc8] sm:$0xff] }
  0x62   : > { %v1406_v36 = vadd.f32 -1.0, %v974_v28  ;;  %v1574_v40 = vpop.eup %1573  ;;  %v975_v41 = vmul.f32 2.0, %v1572_v34  ;;  %v599_v43 = vadd.f32 %v1973_v35, %v548_v32  ;;  %v549_v44 = vmul.f32 %v1954_v12, %v500_v33 }
  0x63   : > { %1069 = vst [vmem:[%s2046_s17 + $0x30] sm:$0xff] %v1405_v30  ;;  %v837_v42 = vmul.f32 %v1961_v18, %v755_v31  ;;  %v1576_v45 = vpop.eup %1575  ;;  %v976_v46 = vmul.f32 2.0, %v1574_v40  ;;  %v550_v47 = vmul.f32 %v1954_v12, %v501_v37  ;;  %v502_v48 = vmin.f32 %v454_v38, 1.0  ;;  %v411_v30 = vld [vmem:[%s1938_s8 + $0xd0] sm:$0xff] }
  0x64   : > { %1070 = vst [vmem:[%s2046_s17 + $0x38] sm:$0xff] %v1406_v36  ;;  %v503_v49 = vmin.f32 %v455_v39, 1.0  ;;  %v1578_v50 = vpop.eup %1577  ;;  %v1407_v51 = vadd.f32 -1.0, %v975_v41  ;;  %v977_v52 = vmul.f32 2.0, %v1576_v45  ;;  %v647_v54 = vmax.f32 %v599_v43, 1e-12 }
  0x65   : > { %v899_v53 = vmul.f32 1.442695, %v837_v42  ;;  %v1408_v56 = vadd.f32 -1.0, %v976_v46  ;;  %v978_v57 = vmul.f32 2.0, %v1578_v50  ;;  %v600_v58 = vadd.f32 %v1973_v35, %v549_v44  ;;  %v412_v36 = vld [vmem:[%s1938_s8 + $0xd8] sm:$0xff] }
  0x66   : > { %v1580_v55 = vpop.eup %1579  ;;  %v601_v59 = vadd.f32 %v1973_v35, %v550_v47  ;;  %1071 = vst [vmem:[%s2046_s17 + $0x40] sm:$0xff] %v1407_v51  ;;  %v1409_v61 = vadd.f32 -1.0, %v977_v52  ;;  %v695_v63 = vmin.f32 %v647_v54, 1.0  ;;  %v551_v9 = vmul.f32 %v1954_v12, %v502_v48 }
  0x67   : > { %v1582_v60 = vpop.eup %1581  ;;  %v979_v62 = vmul.f32 2.0, %v1580_v55  ;;  %1587 = vpow2.f32 %v899_v53  ;;  %1072 = vst [vmem:[%s2046_s17 + $0x48] sm:$0xff] %v1408_v56  ;;  %v1410_v2 = vadd.f32 -1.0, %v978_v57  ;;  %v648_v4 = vmax.f32 %v600_v58, 1e-12  ;;  %v413_v55 = vld [vmem:[%s1938_s8 + $0xe0] sm:$0xff] }
  0x68   : > { %v1584_v1 = vpop.eup %1583  ;;  %v980_v3 = vmul.f32 2.0, %v1582_v60  ;;  %v649_v5 = vmax.f32 %v601_v59, 1e-12  ;;  %1073 = vst [vmem:[%s2046_s17 + $0x50] sm:$0xff] %v1409_v61  ;;  %1589 = vlog2.f32 %v695_v63  ;;  %v552_v17 = vmul.f32 %v1954_v12, %v503_v49 }
  0x69   : > { %v1411_v7 = vadd.f32 -1.0, %v979_v62  ;;  %v757_v8 = vmul.f32 0.6931472, %v1584_v1  ;;  %v1586_v13 = vpop.eup %1585  ;;  %1074 = vst [vmem:[%s2046_s17 + $0x58] sm:$0xff] %v1410_v2  ;;  %v696_v15 = vmin.f32 %v648_v4, 1.0  ;;  %v602_v21 = vadd.f32 %v1973_v35, %v551_v9 }
  0x6a   : > { %v1412_v14 = vadd.f32 -1.0, %v980_v3  ;;  %v697_v16 = vmin.f32 %v649_v5, 1.0  ;;  %v759_v20 = vmul.f32 0.6931472, %v1586_v13  ;;  %v456_v22 = vmul.f32 %v1946_v6, %v407_v0 }
  0x6b   : > { %1075 = vst [vmem:[%s2046_s17 + $0x60] sm:$0xff] %v1411_v7  ;;  %v838_v19 = vmul.f32 %v1961_v18, %v757_v8  ;;  %1591 = vlog2.f32 %v696_v15  ;;  %v603_v23 = vadd.f32 %v1973_v35, %v552_v17  ;;  %v457_v24 = vmul.f32 %v1946_v6, %v408_v10 }
  0x6c   : > { %1076 = vst [vmem:[%s2046_s17 + $0x68] sm:$0xff] %v1412_v14  ;;  %v458_v25 = vmul.f32 %v1946_v6, %v409_v11  ;;  %v839_v28 = vmul.f32 %v1961_v18, %v759_v20  ;;  %1593 = vlog2.f32 %v697_v16  ;;  %v650_v29 = vmax.f32 %v602_v21, 1e-12 }
  0x6d   : > { %v901_v27 = vmul.f32 1.442695, %v838_v19  ;;  %v651_v31 = vmax.f32 %v603_v23, 1e-12  ;;  %v504_v32 = vmin.f32 %v456_v22, 1.0  ;;  %v505_v33 = vmin.f32 %v457_v24, 1.0 }
  0x6e   : > { %v506_v34 = vmin.f32 %v458_v25, 1.0  ;;  %v903_v37 = vmul.f32 1.442695, %v839_v28  ;;  %v698_v38 = vmin.f32 %v650_v29, 1.0  ;;  %v459_v39 = vmul.f32 %v1946_v6, %v410_v26 }
  0x6f   : > { %1595 = vpow2.f32 %v901_v27  ;;  %v699_v40 = vmin.f32 %v651_v31, 1.0  ;;  %v553_v41 = vmul.f32 %v1954_v12, %v504_v32  ;;  %v554_v42 = vmul.f32 %v1954_v12, %v505_v33  ;;  %v414_v31 = vld [vmem:[%s1938_s8 + $0xe8] sm:$0xff]  ;;  %v415_v32 = vld [vmem:[%s1938_s8 + $0xf0] sm:$0xff] }
  0x70   : > { %v555_v43 = vmul.f32 %v1954_v12, %v506_v34  ;;  %1597 = vpow2.f32 %v903_v37  ;;  %v507_v45 = vmin.f32 %v459_v39, 1.0  ;;  %v460_v46 = vmul.f32 %v1946_v6, %v411_v30 }
  0x71   : > { %v1588_v44 = vpop.eup %1587  ;;  %v461_v47 = vmul.f32 %v1946_v6, %v412_v36  ;;  %1599 = vlog2.f32 %v698_v38  ;;  %v604_v49 = vadd.f32 %v1973_v35, %v553_v41  ;;  %v605_v50 = vadd.f32 %v1973_v35, %v554_v42  ;;  %v416_v38 = vld [vmem:[%s1938_s8 + $0xf8] sm:$0xff]  ;;  %v417_v42 = vld [vmem:[%s1938_s8 + $0x100] sm:$0xff] }
  0x72   : > { %v981_v48 = vmul.f32 2.0, %v1588_v44  ;;  %v1590_v51 = vpop.eup %1589  ;;  %1601 = vlog2.f32 %v699_v40  ;;  %v606_v52 = vadd.f32 %v1973_v35, %v555_v43  ;;  %v556_v53 = vmul.f32 %v1954_v12, %v507_v45 }
  0x73   : > { %v508_v54 = vmin.f32 %v460_v46, 1.0  ;;  %v761_v57 = vmul.f32 0.6931472, %v1590_v51  ;;  %v652_v58 = vmax.f32 %v604_v49, 1e-12  ;;  %v509_v59 = vmin.f32 %v461_v47, 1.0 }
  0x74   : > { %v1413_v56 = vadd.f32 -1.0, %v981_v48  ;;  %v653_v60 = vmax.f32 %v605_v50, 1e-12  ;;  %v654_v61 = vmax.f32 %v606_v52, 1e-12  ;;  %v607_v62 = vadd.f32 %v1973_v35, %v556_v53  ;;  %v418_v46 = vld [vmem:[%s1938_s8 + $0x108] sm:$0xff] }
  0x75   : > { %v557_v63 = vmul.f32 %v1954_v12, %v508_v54  ;;  %v1592_v0 = vpop.eup %1591  ;;  %v840_v1 = vmul.f32 %v1961_v18, %v761_v57  ;;  %v700_v2 = vmin.f32 %v652_v58, 1.0  ;;  %v558_v3 = vmul.f32 %v1954_v12, %v509_v59 }
  0x76   : > { %1077 = vst [vmem:[%s2046_s17 + $0x70] sm:$0xff] %v1413_v56  ;;  %v462_v4 = vmul.f32 %v1946_v6, %v413_v55  ;;  %v1594_v5 = vpop.eup %1593  ;;  %v763_v7 = vmul.f32 0.6931472, %v1592_v0  ;;  %v701_v8 = vmin.f32 %v653_v60, 1.0  ;;  %v702_v9 = vmin.f32 %v654_v61, 1.0 }
  0x77   : > { %v655_v10 = vmax.f32 %v607_v62, 1e-12  ;;  %v905_v11 = vmul.f32 1.442695, %v840_v1  ;;  %v765_v13 = vmul.f32 0.6931472, %v1594_v5  ;;  %1603 = vlog2.f32 %v700_v2 }
  0x78   : > { %v608_v14 = vadd.f32 %v1973_v35, %v557_v63  ;;  %v841_v16 = vmul.f32 %v1961_v18, %v763_v7  ;;  %1605 = vlog2.f32 %v701_v8  ;;  %v609_v19 = vadd.f32 %v1973_v35, %v558_v3 }
  0x79   : > { %v1596_v15 = vpop.eup %1595  ;;  %v703_v17 = vmin.f32 %v655_v10, 1.0  ;;  %1607 = vpow2.f32 %v905_v11  ;;  %v842_v21 = vmul.f32 %v1961_v18, %v765_v13  ;;  %v510_v26 = vmin.f32 %v462_v4, 1.0 }
  0x7a   : > { %v982_v20 = vmul.f32 2.0, %v1596_v15  ;;  %v656_v22 = vmax.f32 %v608_v14, 1e-12  ;;  %v1598_v23 = vpop.eup %1597  ;;  %v907_v24 = vmul.f32 1.442695, %v841_v16  ;;  %1609 = vlog2.f32 %v702_v9 }
  0x7b   : > { %v657_v25 = vmax.f32 %v609_v19, 1e-12  ;;  %v1600_v27 = vpop.eup %1599  ;;  %v983_v29 = vmul.f32 2.0, %v1598_v23  ;;  %v909_v30 = vmul.f32 1.442695, %v842_v21  ;;  %1611 = vlog2.f32 %v703_v17 }
  0x7c   : > { %v1414_v28 = vadd.f32 -1.0, %v982_v20  ;;  %v1602_v33 = vpop.eup %1601  ;;  %1613 = vpow2.f32 %v907_v24  ;;  %v767_v34 = vmul.f32 0.6931472, %v1600_v27  ;;  %v704_v36 = vmin.f32 %v656_v22, 1.0 }
  0x7d   : > { %v705_v37 = vmin.f32 %v657_v25, 1.0  ;;  %v1415_v39 = vadd.f32 -1.0, %v983_v29  ;;  %1615 = vpow2.f32 %v909_v30  ;;  %v769_v40 = vmul.f32 0.6931472, %v1602_v33 }
  0x7e   : > { %1078 = vst [vmem:[%s2046_s17 + $0x78] sm:$0xff] %v1414_v28  ;;  %v559_v41 = vmul.f32 %v1954_v12, %v510_v26  ;;  %v843_v43 = vmul.f32 %v1961_v18, %v767_v34  ;;  %1617 = vlog2.f32 %v704_v36  ;;  %v463_v44 = vmul.f32 %v1946_v6, %v414_v31 }
  0x7f   : > { %v464_v45 = vmul.f32 %v1946_v6, %v415_v32  ;;  %1079 = vst [vmem:[%s2046_s17 + $0x80] sm:$0xff] %v1415_v39  ;;  %v844_v47 = vmul.f32 %v1961_v18, %v769_v40  ;;  %1619 = vlog2.f32 %v705_v37  ;;  %v465_v49 = vmul.f32 %v1946_v6, %v416_v38 }
  0x80   : > { %v610_v48 = vadd.f32 %v1973_v35, %v559_v41  ;;  %v911_v50 = vmul.f32 1.442695, %v843_v43  ;;  %v511_v51 = vmin.f32 %v463_v44, 1.0  ;;  %v466_v53 = vmul.f32 %v1946_v6, %v417_v42 }
  0x81   : > { %v512_v52 = vmin.f32 %v464_v45, 1.0  ;;  %v1604_v54 = vpop.eup %1603  ;;  %v913_v55 = vmul.f32 1.442695, %v844_v47  ;;  %v513_v57 = vmin.f32 %v465_v49, 1.0  ;;  %v2129_v58 = vmul.f32 %v1946_v6, %v418_v46  ;;  %v419_v45 = vld [vmem:[%s1938_s8 + $0x110] sm:$0xff] }
  0x82   : > { %v658_v56 = vmax.f32 %v610_v48, 1e-12  ;;  %v1606_v59 = vpop.eup %1605  ;;  %1621 = vpow2.f32 %v911_v50  ;;  %v771_v60 = vmul.f32 0.6931472, %v1604_v54  ;;  %v560_v61 = vmul.f32 %v1954_v12, %v511_v51 }
  0x83   : > { %v561_v62 = vmul.f32 %v1954_v12, %v512_v52  ;;  %v1608_v63 = vpop.eup %1607  ;;  %1623 = vpow2.f32 %v913_v55  ;;  %v773_v0 = vmul.f32 0.6931472, %v1606_v59  ;;  %v562_v2 = vmul.f32 %v1954_v12, %v513_v57  ;;  %v422_v59 = vld [vmem:[%s1938_s8 + $0x128] sm:$0xff] }
  0x84   : > { %v706_v1 = vmin.f32 %v658_v56, 1.0  ;;  %v1610_v3 = vpop.eup %1609  ;;  %v984_v4 = vmul.f32 2.0, %v1608_v63  ;;  %v845_v5 = vmul.f32 %v1961_v18, %v771_v60  ;;  %v611_v7 = vadd.f32 %v1973_v35, %v560_v61 }
  0x85   : > { %v612_v8 = vadd.f32 %v1973_v35, %v561_v62  ;;  %v1612_v9 = vpop.eup %1611  ;;  %v846_v10 = vmul.f32 %v1961_v18, %v773_v0  ;;  %v775_v11 = vmul.f32 0.6931472, %v1610_v3  ;;  %v613_v13 = vadd.f32 %v1973_v35, %v562_v2 }
  0x86   : > { %1625 = vlog2.f32 %v706_v1  ;;  %v1614_v14 = vpop.eup %1613  ;;  %v1416_v15 = vadd.f32 -1.0, %v984_v4  ;;  %v915_v16 = vmul.f32 1.442695, %v845_v5  ;;  %v777_v17 = vmul.f32 0.6931472, %v1612_v9 }
  0x87   : > { %v514_v19 = vmin.f32 %v466_v53, 1.0  ;;  %v1616_v20 = vpop.eup %1615  ;;  %v985_v21 = vmul.f32 2.0, %v1614_v14  ;;  %v917_v22 = vmul.f32 1.442695, %v846_v10  ;;  %v847_v23 = vmul.f32 %v1961_v18, %v775_v11  ;;  %v420_v53 = vld [vmem:[%s1938_s8 + $0x118] sm:$0xff] }
  0x88   : > { %v659_v24 = vmax.f32 %v611_v7, 1e-12  ;;  %v1618_v25 = vpop.eup %1617  ;;  %1080 = vst [vmem:[%s2046_s17 + $0x88] sm:$0xff] %v1416_v15  ;;  %v986_v26 = vmul.f32 2.0, %v1616_v20  ;;  %1627 = vpow2.f32 %v915_v16  ;;  %v848_v27 = vmul.f32 %v1961_v18, %v777_v17 }
  0x89   : > { %v660_v28 = vmax.f32 %v612_v8, 1e-12  ;;  %v1620_v29 = vpop.eup %1619  ;;  %v1417_v30 = vadd.f32 -1.0, %v985_v21  ;;  %1629 = vpow2.f32 %v917_v22  ;;  %v919_v31 = vmul.f32 1.442695, %v847_v23 }
  0x8a   : > { %v779_v32 = vmul.f32 0.6931472, %v1618_v25  ;;  %v1418_v33 = vadd.f32 -1.0, %v986_v26  ;;  %v921_v34 = vmul.f32 1.442695, %v848_v27  ;;  %v707_v37 = vmin.f32 %v659_v24, 1.0 }
  0x8b   : > { %v781_v36 = vmul.f32 0.6931472, %v1620_v29  ;;  %1081 = vst [vmem:[%s2046_s17 + $0x90] sm:$0xff] %v1417_v30  ;;  %1631 = vpow2.f32 %v919_v31  ;;  %v708_v39 = vmin.f32 %v660_v28, 1.0  ;;  %v661_v40 = vmax.f32 %v613_v13, 1e-12 }
  0x8c   : > { %v849_v38 = vmul.f32 %v1961_v18, %v779_v32  ;;  %v1622_v41 = vpop.eup %1621  ;;  %1082 = vst [vmem:[%s2046_s17 + $0x98] sm:$0xff] %v1418_v33  ;;  %1633 = vpow2.f32 %v921_v34  ;;  %v563_v43 = vmul.f32 %v1954_v12, %v514_v19  ;;  %v515_v44 = vmin.f32 %v2129_v58, 1.0  ;;  %v421_v58 = vld [vmem:[%s1938_s8 + $0x120] sm:$0xff] }
  0x8d   : > { %v850_v42 = vmul.f32 %v1961_v18, %v781_v36  ;;  %v1624_v46 = vpop.eup %1623  ;;  %v987_v47 = vmul.f32 2.0, %v1622_v41  ;;  %1635 = vlog2.f32 %v707_v37  ;;  %v709_v49 = vmin.f32 %v661_v40, 1.0 }
  0x8e   : > { %v923_v48 = vmul.f32 1.442695, %v849_v38  ;;  %v988_v50 = vmul.f32 2.0, %v1624_v46  ;;  %1637 = vlog2.f32 %v708_v39  ;;  %v614_v52 = vadd.f32 %v1973_v35, %v563_v43 }
  0x8f   : > { %v925_v51 = vmul.f32 1.442695, %v850_v42  ;;  %v1419_v55 = vadd.f32 -1.0, %v987_v47  ;;  %v564_v56 = vmul.f32 %v1954_v12, %v515_v44  ;;  %v468_v57 = vmul.f32 %v1946_v6, %v419_v45 }
  0x90   : > { %v1626_v54 = vpop.eup %1625  ;;  %1639 = vpow2.f32 %v923_v48  ;;  %v1420_v60 = vadd.f32 -1.0, %v988_v50  ;;  %v662_v62 = vmax.f32 %v614_v52, 1e-12  ;;  %v469_v1 = vmul.f32 %v1946_v6, %v420_v53  ;;  %v424_v52 = vld [vmem:[%s1938_s8 + $0x138] sm:$0xff]  ;;  %v425_v53 = vld [vmem:[%s1938_s8 + $0x140] sm:$0xff] }
  0x91   : > { %1641 = vpow2.f32 %v925_v51  ;;  %v783_v61 = vmul.f32 0.6931472, %v1626_v54  ;;  %1083 = vst [vmem:[%s2046_s17 + $0xa0] sm:$0xff] %v1419_v55  ;;  %v615_v63 = vadd.f32 %v1973_v35, %v564_v56  ;;  %v516_v0 = vmin.f32 %v468_v57, 1.0  ;;  %v423_v51 = vld [vmem:[%s1938_s8 + $0x130] sm:$0xff] }
  0x92   : > { %1643 = vlog2.f32 %v709_v49  ;;  %v1628_v2 = vpop.eup %1627  ;;  %1084 = vst [vmem:[%s2046_s17 + $0xa8] sm:$0xff] %v1420_v60  ;;  %v710_v4 = vmin.f32 %v662_v62, 1.0  ;;  %v470_v5 = vmul.f32 %v1946_v6, %v421_v58  ;;  %v471_v7 = vmul.f32 %v1946_v6, %v422_v59 }
  0x93   : > { %v851_v3 = vmul.f32 %v1961_v18, %v783_v61  ;;  %v1630_v8 = vpop.eup %1629  ;;  %v989_v9 = vmul.f32 2.0, %v1628_v2  ;;  %v663_v10 = vmax.f32 %v615_v63, 1e-12  ;;  %v565_v11 = vmul.f32 %v1954_v12, %v516_v0 }
  0x94   : > { %v517_v13 = vmin.f32 %v469_v1, 1.0  ;;  %v990_v14 = vmul.f32 2.0, %v1630_v8  ;;  %1645 = vlog2.f32 %v710_v4  ;;  %v518_v16 = vmin.f32 %v470_v5, 1.0 }
  0x95   : > { %v927_v15 = vmul.f32 1.442695, %v851_v3  ;;  %v1632_v17 = vpop.eup %1631  ;;  %v1421_v19 = vadd.f32 -1.0, %v989_v9  ;;  %v711_v20 = vmin.f32 %v663_v10, 1.0  ;;  %v616_v21 = vadd.f32 %v1973_v35, %v565_v11 }
  0x96   : > { %v566_v22 = vmul.f32 %v1954_v12, %v517_v13  ;;  %v1634_v23 = vpop.eup %1633  ;;  %v1422_v24 = vadd.f32 -1.0, %v990_v14  ;;  %v991_v25 = vmul.f32 2.0, %v1632_v17  ;;  %v567_v26 = vmul.f32 %v1954_v12, %v518_v16 }
  0x97   : > { %1647 = vpow2.f32 %v927_v15  ;;  %v1636_v27 = vpop.eup %1635  ;;  %1085 = vst [vmem:[%s2046_s17 + $0xb0] sm:$0xff] %v1421_v19  ;;  %v992_v28 = vmul.f32 2.0, %v1634_v23  ;;  %v664_v29 = vmax.f32 %v616_v21, 1e-12  ;;  %v519_v36 = vmin.f32 %v471_v7, 1.0  ;;  %v426_v15 = vld [vmem:[%s1938_s8 + $0x148] sm:$0xff] }
  0x98   : > { %1649 = vlog2.f32 %v711_v20  ;;  %v617_v30 = vadd.f32 %v1973_v35, %v566_v22  ;;  %v1638_v31 = vpop.eup %1637  ;;  %1086 = vst [vmem:[%s2046_s17 + $0xb8] sm:$0xff] %v1422_v24  ;;  %v1423_v32 = vadd.f32 -1.0, %v991_v25  ;;  %v785_v33 = vmul.f32 0.6931472, %v1636_v27  ;;  %v427_v20 = vld [vmem:[%s1938_s8 + $0x150] sm:$0xff]  ;;  %v428_v21 = vld [vmem:[%s1938_s8 + $0x158] sm:$0xff] }
  0x99   : > { %v618_v34 = vadd.f32 %v1973_v35, %v567_v26  ;;  %v1424_v38 = vadd.f32 -1.0, %v992_v28  ;;  %v787_v39 = vmul.f32 0.6931472, %v1638_v31  ;;  %v712_v40 = vmin.f32 %v664_v29, 1.0  ;;  %v429_v25 = vld [vmem:[%s1938_s8 + $0x160] sm:$0xff] }
  0x9a   : > { %v1640_v37 = vpop.eup %1639  ;;  %v665_v41 = vmax.f32 %v617_v30, 1e-12  ;;  %1087 = vst [vmem:[%s2046_s17 + $0xc0] sm:$0xff] %v1423_v32  ;;  %v852_v44 = vmul.f32 %v1961_v18, %v785_v33  ;;  %v568_v46 = vmul.f32 %v1954_v12, %v519_v36  ;;  %v472_v63 = vmul.f32 %v1946_v6, %v423_v51 }
  0x9b   : > { %v1642_v42 = vpop.eup %1641  ;;  %v993_v43 = vmul.f32 2.0, %v1640_v37  ;;  %v666_v45 = vmax.f32 %v618_v34, 1e-12  ;;  %1088 = vst [vmem:[%s2046_s17 + $0xc8] sm:$0xff] %v1424_v38  ;;  %v853_v49 = vmul.f32 %v1961_v18, %v787_v39  ;;  %1651 = vlog2.f32 %v712_v40 }
  0x9c   : > { %v1644_v47 = vpop.eup %1643  ;;  %v994_v48 = vmul.f32 2.0, %v1642_v42  ;;  %v713_v50 = vmin.f32 %v665_v41, 1.0  ;;  %v929_v55 = vmul.f32 1.442695, %v852_v44  ;;  %v619_v60 = vadd.f32 %v1973_v35, %v568_v46 }
  0x9d   : > { %v1425_v54 = vadd.f32 -1.0, %v993_v43  ;;  %v789_v56 = vmul.f32 0.6931472, %v1644_v47  ;;  %v714_v57 = vmin.f32 %v666_v45, 1.0  ;;  %v931_v59 = vmul.f32 1.442695, %v853_v49 }
  0x9e   : > { %v1426_v58 = vadd.f32 -1.0, %v994_v48  ;;  %1653 = vlog2.f32 %v713_v50  ;;  %v1646_v61 = vpop.eup %1645  ;;  %v473_v0 = vmul.f32 %v1946_v6, %v424_v52  ;;  %v667_v2 = vmax.f32 %v619_v60, 1e-12 }
  0x9f   : > { %1089 = vst [vmem:[%s2046_s17 + $0xd0] sm:$0xff] %v1425_v54  ;;  %1655 = vpow2.f32 %v929_v55  ;;  %v854_v62 = vmul.f32 %v1961_v18, %v789_v56  ;;  %v791_v1 = vmul.f32 0.6931472, %v1646_v61  ;;  %v474_v3 = vmul.f32 %v1946_v6, %v425_v53 }
  0xa0   : > { %1090 = vst [vmem:[%s2046_s17 + $0xd8] sm:$0xff] %v1426_v58  ;;  %1657 = vpow2.f32 %v931_v59  ;;  %v520_v7 = vmin.f32 %v472_v63, 1.0  ;;  %v521_v8 = vmin.f32 %v473_v0, 1.0  ;;  %v715_v13 = vmin.f32 %v667_v2, 1.0 }
  0xa1   : > { %v1648_v4 = vpop.eup %1647  ;;  %v933_v5 = vmul.f32 1.442695, %v854_v62  ;;  %1659 = vlog2.f32 %v714_v57  ;;  %v855_v11 = vmul.f32 %v1961_v18, %v791_v1  ;;  %v522_v14 = vmin.f32 %v474_v3, 1.0 }
  0xa2   : > { %v1650_v9 = vpop.eup %1649  ;;  %v995_v10 = vmul.f32 2.0, %v1648_v4  ;;  %v569_v17 = vmul.f32 %v1954_v12, %v520_v7  ;;  %v570_v19 = vmul.f32 %v1954_v12, %v521_v8  ;;  %v475_v29 = vmul.f32 %v1946_v6, %v426_v15  ;;  %v430_v8 = vld [vmem:[%s1938_s8 + $0x168] sm:$0xff] }
  0xa3   : > { %1661 = vpow2.f32 %v933_v5  ;;  %v793_v16 = vmul.f32 0.6931472, %v1650_v9  ;;  %v935_v23 = vmul.f32 1.442695, %v855_v11  ;;  %v571_v24 = vmul.f32 %v1954_v12, %v522_v14  ;;  %v431_v9 = vld [vmem:[%s1938_s8 + $0x170] sm:$0xff] }
  0xa4   : > { %v1427_v22 = vadd.f32 -1.0, %v995_v10  ;;  %1663 = vlog2.f32 %v715_v13  ;;  %v620_v27 = vadd.f32 %v1973_v35, %v569_v17  ;;  %v621_v28 = vadd.f32 %v1973_v35, %v570_v19 }
  0xa5   : > { %v856_v26 = vmul.f32 %v1961_v18, %v793_v16  ;;  %v1652_v30 = vpop.eup %1651  ;;  %1665 = vpow2.f32 %v935_v23  ;;  %v622_v31 = vadd.f32 %v1973_v35, %v571_v24  ;;  %v476_v32 = vmul.f32 %v1946_v6, %v427_v20  ;;  %v432_v24 = vld [vmem:[%s1938_s8 + $0x178] sm:$0xff]  ;;  %s1736_s8 = sshll.u32 %s1818_s7, 4  ;;  %s1737_s8 = int_to_ptr.vmem [resolvable:$false] %s1736_s8 }
  0xa6   : > { %1091 = vst [vmem:[%s2046_s17 + $0xe0] sm:$0xff] %v1427_v22  ;;  %v477_v33 = vmul.f32 %v1946_v6, %v428_v21  ;;  %v795_v36 = vmul.f32 0.6931472, %v1652_v30  ;;  %v668_v37 = vmax.f32 %v620_v27, 1e-12  ;;  %v478_v38 = vmul.f32 %v1946_v6, %v429_v25  ;;  %s1738_s9 = scalar_lea.vmem %s1737_s8, 12288  ;;  %p1739_p0 = scmp.lt.s32.totalorder %s2347_s16, %s1737_s8 }
  0xa7   : > { %v937_v34 = vmul.f32 1.442695, %v856_v26  ;;  %v669_v40 = vmax.f32 %v621_v28, 1e-12  ;;  %v670_v41 = vmax.f32 %v622_v31, 1e-12  ;;  %v479_v22 = vmul.f32 %v1946_v6, %v430_v8 }
  0xa8   : > { %v1654_v39 = vpop.eup %1653  ;;  %v523_v42 = vmin.f32 %v475_v29, 1.0  ;;  %v524_v43 = vmin.f32 %v476_v32, 1.0  ;;  %v857_v45 = vmul.f32 %v1961_v18, %v795_v36  ;;  %v716_v47 = vmin.f32 %v668_v37, 1.0 }
  0xa9   : > { %v1656_v44 = vpop.eup %1655  ;;  %1667 = vpow2.f32 %v937_v34  ;;  %v797_v46 = vmul.f32 0.6931472, %v1654_v39  ;;  %v717_v50 = vmin.f32 %v669_v40, 1.0  ;;  %v718_v51 = vmin.f32 %v670_v41, 1.0 }
  0xaa   : > { %v1658_v48 = vpop.eup %1657  ;;  %v996_v49 = vmul.f32 2.0, %v1656_v44  ;;  %v572_v52 = vmul.f32 %v1954_v12, %v523_v42  ;;  %v939_v55 = vmul.f32 1.442695, %v857_v45  ;;  %1669 = vlog2.f32 %v716_v47 }
  0xab   : > { %v1660_v53 = vpop.eup %1659  ;;  %v997_v54 = vmul.f32 2.0, %v1658_v48  ;;  %v858_v56 = vmul.f32 %v1961_v18, %v797_v46  ;;  %1671 = vlog2.f32 %v717_v50  ;;  %v573_v63 = vmul.f32 %v1954_v12, %v524_v43 }
  0xac   : > { %v1428_v57 = vadd.f32 -1.0, %v996_v49  ;;  %v799_v58 = vmul.f32 0.6931472, %v1660_v53  ;;  %v623_v59 = vadd.f32 %v1973_v35, %v572_v52  ;;  %1673 = vpow2.f32 %v939_v55 }
  0xad   : > { %v1662_v60 = vpop.eup %1661  ;;  %v1429_v61 = vadd.f32 -1.0, %v997_v54  ;;  %v941_v62 = vmul.f32 1.442695, %v858_v56  ;;  %1675 = vlog2.f32 %v718_v51  ;;  %v624_v5 = vadd.f32 %v1973_v35, %v573_v63 }
  0xae   : > { %v1664_v0 = vpop.eup %1663  ;;  %1092 = vst [vmem:[%s2046_s17 + $0xe8] sm:$0xff] %v1428_v57  ;;  %v998_v1 = vmul.f32 2.0, %v1662_v60  ;;  %v859_v2 = vmul.f32 %v1961_v18, %v799_v58  ;;  %v671_v3 = vmax.f32 %v623_v59, 1e-12  ;;  %v525_v7 = vmin.f32 %v477_v33, 1.0 }
  0xaf   : > { %1093 = vst [vmem:[%s2046_s17 + $0xf0] sm:$0xff] %v1429_v61  ;;  %1677 = vpow2.f32 %v941_v62  ;;  %v801_v4 = vmul.f32 0.6931472, %v1664_v0  ;;  %v1666_v10 = vpop.eup %1665  ;;  %v526_v15 = vmin.f32 %v478_v38, 1.0  ;;  %v672_v19 = vmax.f32 %v624_v5, 1e-12 }
  0xb0   : > { %v1430_v11 = vadd.f32 -1.0, %v998_v1  ;;  %v943_v13 = vmul.f32 1.442695, %v859_v2  ;;  %v719_v14 = vmin.f32 %v671_v3, 1.0  ;;  %v999_v16 = vmul.f32 2.0, %v1666_v10  ;;  %v1111_v61 = vld [vmem:[%s2232_s29] sm:$0xff] }
  0xb1   : > { %v860_v17 = vmul.f32 %v1961_v18, %v801_v4  ;;  %v574_v20 = vmul.f32 %v1954_v12, %v525_v7  ;;  %v575_v21 = vmul.f32 %v1954_v12, %v526_v15  ;;  %v480_v23 = vmul.f32 %v1946_v6, %v431_v9  ;;  %v1113_v2 = vld [vmem:[%s2232_s29 + $0x10] sm:$0xff]  ;;  %v1115_v3 = vld [vmem:[%s2232_s29 + $0x20] sm:$0xff] }
  0xb2   : > { %1094 = vst [vmem:[%s2046_s17 + $0xf8] sm:$0xff] %v1430_v11  ;;  %1679 = vpow2.f32 %v943_v13  ;;  %v1431_v26 = vadd.f32 -1.0, %v999_v16  ;;  %v720_v28 = vmin.f32 %v672_v19, 1.0  ;;  %v527_v32 = vmin.f32 %v479_v22, 1.0  ;;  %v1117_v9 = vld [vmem:[%s2232_s29 + $0x30] sm:$0xff]  ;;  %v1112_v16 = vld [vmem:[%s2232_s29 + $0x8] sm:$0xff] }
  0xb3   : > { %v1668_v25 = vpop.eup %1667  ;;  %v945_v27 = vmul.f32 1.442695, %v860_v17  ;;  %1681 = vlog2.f32 %v719_v14  ;;  %v625_v30 = vadd.f32 %v1973_v35, %v574_v20  ;;  %v626_v31 = vadd.f32 %v1973_v35, %v575_v21  ;;  %v1127_v14 = vld [vmem:[%s2243_s10] sm:$0xff]  ;;  %v1114_v17 = vld [vmem:[%s2232_s29 + $0x18] sm:$0xff] }
  0xb4   : > { %v1000_v29 = vmul.f32 2.0, %v1668_v25  ;;  %v1670_v33 = vpop.eup %1669  ;;  %1095 = vst [vmem:[%s2046_s17 + $0x100] sm:$0xff] %v1431_v26  ;;  %v528_v34 = vmin.f32 %v480_v23, 1.0  ;;  %v481_v36 = vmul.f32 %v1946_v6, %v432_v24  ;;  %v576_v44 = vmul.f32 %v1954_v12, %v527_v32  ;;  %v1116_v23 = vld [vmem:[%s2232_s29 + $0x28] sm:$0xff]  ;;  %v1118_v24 = vld [vmem:[%s2232_s29 + $0x38] sm:$0xff] }
  0xb5   : > { %1683 = vpow2.f32 %v945_v27  ;;  %v1672_v37 = vpop.eup %1671  ;;  %v803_v39 = vmul.f32 0.6931472, %v1670_v33  ;;  %v673_v40 = vmax.f32 %v625_v30, 1e-12  ;;  %v674_v43 = vmax.f32 %v626_v31, 1e-12 }
  0xb6   : > { %v1432_v38 = vadd.f32 -1.0, %v1000_v29  ;;  %1685 = vlog2.f32 %v720_v28  ;;  %v1674_v41 = vpop.eup %1673  ;;  %v805_v42 = vmul.f32 0.6931472, %v1672_v37  ;;  %v577_v45 = vmul.f32 %v1954_v12, %v528_v34  ;;  %v1128_v27 = vld [vmem:[%s2243_s10 + $0x8] sm:$0xff]  ;;  %v1119_v30 = vld [vmem:[%s2232_s29 + $0x40] sm:$0xff]  ;;  %v1121_v33 = vld [vmem:[%s2232_s29 + $0x50] sm:$0xff] }
  0xb7   : > { %v1676_v46 = vpop.eup %1675  ;;  %v1001_v47 = vmul.f32 2.0, %v1674_v41  ;;  %v861_v48 = vmul.f32 %v1961_v18, %v803_v39  ;;  %v721_v6 = vmin.f32 %v673_v40, 1.0  ;;  %v529_v49 = vmin.f32 %v481_v36, 1.0  ;;  %v1123_v34 = vld [vmem:[%s2232_s29 + $0x60] sm:$0xff]  ;;  %v1125_v37 = vld [vmem:[%s2232_s29 + $0x70] sm:$0xff] }
  0xb8   : > { %1096 = vst [vmem:[%s2046_s17 + $0x108] sm:$0xff] %v1432_v38  ;;  %v862_v51 = vmul.f32 %v1961_v18, %v805_v42  ;;  %v807_v52 = vmul.f32 0.6931472, %v1676_v46  ;;  %v722_v53 = vmin.f32 %v674_v43, 1.0  ;;  %v627_v54 = vadd.f32 %v1973_v35, %v576_v44  ;;  %v1129_v38 = vld [vmem:[%s2243_s10 + $0x10] sm:$0xff] }
  0xb9   : > { %v1678_v50 = vpop.eup %1677  ;;  %v1433_v55 = vadd.f32 -1.0, %v1001_v47  ;;  %v947_v57 = vmul.f32 1.442695, %v861_v48  ;;  %1687 = vlog2.f32 %v721_v6  ;;  %v628_v0 = vadd.f32 %v1973_v35, %v577_v45  ;;  %v1120_v48 = vld [vmem:[%s2232_s29 + $0x48] sm:$0xff] }
  0xba   : > { %v1002_v56 = vmul.f32 2.0, %v1678_v50  ;;  %v949_v58 = vmul.f32 1.442695, %v862_v51  ;;  %v863_v59 = vmul.f32 %v1961_v18, %v807_v52  ;;  %1689 = vlog2.f32 %v722_v53  ;;  %v1122_v51 = vld [vmem:[%s2232_s29 + $0x58] sm:$0xff] }
  0xbb   : > { %v675_v60 = vmax.f32 %v627_v54, 1e-12  ;;  %1097 = vst [vmem:[%s2046_s17 + $0x110] sm:$0xff] %v1433_v55  ;;  %1691 = vpow2.f32 %v947_v57  ;;  %v578_v1 = vmul.f32 %v1954_v12, %v529_v49  ;;  %v676_v11 = vmax.f32 %v628_v0, 1e-12  ;;  %v1124_v54 = vld [vmem:[%s2232_s29 + $0x68] sm:$0xff] }
  0xbc   : > { %v1680_v62 = vpop.eup %1679  ;;  %v1434_v63 = vadd.f32 -1.0, %v1002_v56  ;;  %1693 = vpow2.f32 %v949_v58  ;;  %v951_v7 = vmul.f32 1.442695, %v863_v59  ;;  %vm1135_vm0 = vcmp.lt.f32.partialorder %v1111_v61, 256.0  ;;  %v1126_v55 = vld [vmem:[%s2232_s29 + $0x78] sm:$0xff]  ;;  %s1732_s29 = scalar_lea.vmem %s2347_s16, 6144 }
  0xbd   : > { %v1682_v4 = vpop.eup %1681  ;;  %v1003_v5 = vmul.f32 2.0, %v1680_v62  ;;  %v723_v8 = vmin.f32 %v675_v60, 1.0  ;;  %v629_v13 = vadd.f32 %v1973_v35, %v578_v1  ;;  %vm1137_vm1 = vcmp.lt.f32.partialorder %v1113_v2, 256.0  ;;  %v1130_v1 = vld [vmem:[%s2243_s10 + $0x18] sm:$0xff]  ;;  %p1733_p10 = scmp.ne.s32.totalorder %s2347_s16, %s1732_s29  ;;  %p1740_p1 = scmp.lt.s32.totalorder %s1738_s9, %s1732_s29 }
  0xbe   : > { %1098 = vst [vmem:[%s2046_s17 + $0x118] sm:$0xff] %v1434_v63  ;;  %v809_v10 = vmul.f32 0.6931472, %v1682_v4  ;;  %1695 = vpow2.f32 %v951_v7  ;;  %vm1139_vm2 = vcmp.lt.f32.partialorder %v1115_v3, 256.0  ;;  %v724_v35 = vmin.f32 %v676_v11, 1.0  ;;  %vm2258_vm3 = vmpackc.low %vm1137_vm1, %vm1135_vm0 }
  0xbf   : > { %v1684_v12 = vpop.eup %1683  ;;  %v1435_v15 = vadd.f32 -1.0, %v1003_v5  ;;  %1697 = vlog2.f32 %v723_v8  ;;  %v677_v26 = vmax.f32 %v629_v13, 1e-12  ;;  %vm1131_vm4 = vnez %v1127_v14  ;;  %p1734_p11 = pnand %p1733_p10, %p1891_p4  ;;  %p1741_p2 = por %p1740_p1, %p1739_p0 }
  0xc0   : > { %v1686_v19 = vpop.eup %1685  ;;  %v1004_v20 = vmul.f32 2.0, %v1684_v12  ;;  %v864_v21 = vmul.f32 %v1961_v18, %v809_v10  ;;  %vm1141_vm5 = vcmp.lt.f32.partialorder %v1117_v9, 256.0  ;;  %1699 = vlog2.f32 %v724_v35 }
  0xc1   : > { %1099 = vst [vmem:[%s2046_s17 + $0x120] sm:$0xff] %v1435_v15  ;;  %v811_v25 = vmul.f32 0.6931472, %v1686_v19  ;;  %vm1152_vm6 = vmpackc.low %vm1141_vm5, %vm1139_vm2  ;;  %v725_v32 = vmin.f32 %v677_v26, 1.0  ;;  %vm1136_vm8 = vcmp.lt.f32.partialorder %v1112_v16, 256.0  ;;  %vm1138_vm9 = vcmp.lt.f32.partialorder %v1114_v17, 256.0  ;;  %p1735_p13 = pneg %p1734_p11 }
  0xc2   : > { %v1436_v28 = vadd.f32 -1.0, %v1004_v20  ;;  %v953_v29 = vmul.f32 1.442695, %v864_v21  ;;  %vm1153_vm7 = vmpackc.even %vm1152_vm6, %vm2258_vm3  ;;  %vm1132_vm11 = vnez %v1128_v27  ;;  %vm1140_vm12 = vcmp.lt.f32.partialorder %v1116_v23, 256.0 }
  0xc3   : > { %v865_v31 = vmul.f32 %v1961_v18, %v811_v25  ;;  %v1688_v36 = vpop.eup %1687  ;;  %vm1163_vm10 = vmand %vm1131_vm4, %vm1153_vm7  ;;  %vm1142_vm13 = vcmp.lt.f32.partialorder %v1118_v24, 256.0  ;;  %v1817_v42 = vmov 0   ;;  %vm1143_vm0 = vcmp.lt.f32.partialorder %v1119_v30, 256.0  ;;  %p1742_p3 = pnand %p1741_p2, %p1735_p13 }
  0xc4   : > { %1100 = vst [vmem:[%s2046_s17 + $0x128] sm:$0xff] %v1436_v28  ;;  %1701 = vpow2.f32 %v953_v29  ;;  %v1690_v39 = vpop.eup %1689  ;;  %v813_v41 = vmul.f32 0.6931472, %v1688_v36  ;;  %v1167_v43 = vsel %vm1163_vm10, 16843009, %v1817_v42  ;;  %vm2287_vm14 = vmpackc.low %vm1138_vm9, %vm1136_vm8  ;;  %vm1145_vm1 = vcmp.lt.f32.partialorder %v1121_v33, 256.0 }
  0xc5   : > { %v955_v40 = vmul.f32 1.442695, %v865_v31  ;;  %1703 = vlog2.f32 %v725_v32  ;;  %v1692_v45 = vpop.eup %1691  ;;  %v815_v46 = vmul.f32 0.6931472, %v1690_v39  ;;  %1171 = vst [vmem:[%s2274_s13] sm:$0xff] %v1167_v43  ;;  %vm2292_vm15 = vmpackc.low %vm1142_vm13, %vm1140_vm12  ;;  %vm1147_vm2 = vcmp.lt.f32.partialorder %v1123_v34, 256.0 }
  0xc6   : > { %v1694_v6 = vpop.eup %1693  ;;  %v1005_v49 = vmul.f32 2.0, %v1692_v45  ;;  %v866_v50 = vmul.f32 %v1961_v18, %v813_v41  ;;  %vm1156_vm3 = vmpackc.even %vm2292_vm15, %vm2287_vm14  ;;  %vm1149_vm4 = vcmp.lt.f32.partialorder %v1125_v37, 256.0  ;;  %vm1133_vm6 = vnez %v1129_v38 }
  0xc7   : > { %1705 = vpow2.f32 %v955_v40  ;;  %v1006_v52 = vmul.f32 2.0, %v1694_v6  ;;  %v867_v53 = vmul.f32 %v1961_v18, %v815_v46  ;;  %vm1164_vm5 = vmand %vm1132_vm11, %vm1156_vm3  ;;  %vm1144_vm8 = vcmp.lt.f32.partialorder %v1120_v48, 256.0 }
  0xc8   : > { %v1696_v56 = vpop.eup %1695  ;;  %v1437_v57 = vadd.f32 -1.0, %v1005_v49  ;;  %v957_v58 = vmul.f32 1.442695, %v866_v50  ;;  %v1168_v59 = vsel %vm1164_vm5, 16843009, %v1817_v42  ;;  %vm2310_vm7 = vmpackc.low %vm1145_vm1, %vm1143_vm0  ;;  %vm1146_vm10 = vcmp.lt.f32.partialorder %v1122_v51, 256.0 }
  0xc9   : > { %v1698_v61 = vpop.eup %1697  ;;  %v1438_v62 = vadd.f32 -1.0, %v1006_v52  ;;  %v1007_v63 = vmul.f32 2.0, %v1696_v56  ;;  %v959_v0 = vmul.f32 1.442695, %v867_v53  ;;  %1172 = vst [vmem:[%s2274_s13 + $0x8] sm:$0xff] %v1168_v59  ;;  %vm1158_vm9 = vmpackc.low %vm1149_vm4, %vm1147_vm2  ;;  %vm1148_vm12 = vcmp.lt.f32.partialorder %v1124_v54, 256.0 }
  0xca   : > { %1101 = vst [vmem:[%s2046_s17 + $0x130] sm:$0xff] %v1437_v57  ;;  %1707 = vpow2.f32 %v957_v58  ;;  %v817_v2 = vmul.f32 0.6931472, %v1698_v61  ;;  %vm1159_vm11 = vmpackc.even %vm1158_vm9, %vm2310_vm7  ;;  %vm1150_vm13 = vcmp.lt.f32.partialorder %v1126_v55, 256.0  ;;  %v1700_v3 = vpop.eup %1699  ;;  %vm1134_vm15 = vnez %v1130_v1 }
  0xcb   : > { %1102 = vst [vmem:[%s2046_s17 + $0x138] sm:$0xff] %v1438_v62  ;;  %v1439_v4 = vadd.f32 -1.0, %v1007_v63  ;;  %1709 = vpow2.f32 %v959_v0  ;;  %vm1165_vm14 = vmand %vm1133_vm6, %vm1159_vm11  ;;  %v819_v7 = vmul.f32 0.6931472, %v1700_v3 }
  0xcc   : > { %v868_v5 = vmul.f32 %v1961_v18, %v817_v2  ;;  %v1169_v8 = vsel %vm1165_vm14, 16843009, %v1817_v42  ;;  %vm1160_vm0 = vmpackc.low %vm1146_vm10, %vm1144_vm8 }
  0xcd   : > { %1103 = vst [vmem:[%s2046_s17 + $0x140] sm:$0xff] %v1439_v4  ;;  %1173 = vst [vmem:[%s2274_s13 + $0x10] sm:$0xff] %v1169_v8  ;;  %v869_v14 = vmul.f32 %v1961_v18, %v819_v7 }
  0xce   : > { %v1702_v9 = vpop.eup %1701  ;;  %vm1161_vm1 = vmpackc.low %vm1150_vm13, %vm1148_vm12  ;;  %v961_v13 = vmul.f32 1.442695, %v868_v5 }
  0xcf   : > { %v1704_v10 = vpop.eup %1703  ;;  %v1008_v11 = vmul.f32 2.0, %v1702_v9  ;;  %vm1162_vm2 = vmpackc.even %vm1161_vm1, %vm1160_vm0  ;;  %v963_v17 = vmul.f32 1.442695, %v869_v14 }
  0xd0   : > { %v821_v12 = vmul.f32 0.6931472, %v1704_v10  ;;  %vm1166_vm3 = vmand %vm1134_vm15, %vm1162_vm2  ;;  %1711 = vpow2.f32 %v961_v13 }
  0xd1   : > { %v1706_v15 = vpop.eup %1705  ;;  %v1440_v16 = vadd.f32 -1.0, %v1008_v11  ;;  %v1170_v19 = vsel %vm1166_vm3, 16843009, %v1817_v42  ;;  %1713 = vpow2.f32 %v963_v17 }
  0xd2   : > { %v1009_v20 = vmul.f32 2.0, %v1706_v15  ;;  %v870_v21 = vmul.f32 %v1961_v18, %v821_v12  ;;  %1174 = vst [vmem:[%s2274_s13 + $0x18] sm:$0xff] %v1170_v19 }
  0xd3   : > { %1104 = vst [vmem:[%s2046_s17 + $0x148] sm:$0xff] %v1440_v16 }
  0xd4   : > { %v1441_v35 = vadd.f32 -1.0, %v1009_v20  ;;  %v965_v22 = vmul.f32 1.442695, %v870_v21  ;;  %v1708_v23 = vpop.eup %1707 }
  0xd5   : > { %v1710_v24 = vpop.eup %1709  ;;  %v1010_v25 = vmul.f32 2.0, %v1708_v23 }
  0xd6   : > { %1105 = vst [vmem:[%s2046_s17 + $0x150] sm:$0xff] %v1441_v35  ;;  %1715 = vpow2.f32 %v965_v22  ;;  %v1011_v26 = vmul.f32 2.0, %v1710_v24 }
  0xd7   : > { %v1442_v27 = vadd.f32 -1.0, %v1010_v25 }
  0xd8   : > { %v1443_v28 = vadd.f32 -1.0, %v1011_v26 }
  0xd9   : > { %1106 = vst [vmem:[%s2046_s17 + $0x158] sm:$0xff] %v1442_v27 }
  0xda   : > { %v1712_v18 = vpop.eup %1711  ;;  %1107 = vst [vmem:[%s2046_s17 + $0x160] sm:$0xff] %v1443_v28 }
  0xdb   : > { %v1012_v29 = vmul.f32 2.0, %v1712_v18  ;;  %v1714_v30 = vpop.eup %1713 }
  0xdc   : > { %v1013_v32 = vmul.f32 2.0, %v1714_v30 }
  0xdd   : > { %v1444_v31 = vadd.f32 -1.0, %v1012_v29 }
  0xde   : > { %v1445_v34 = vadd.f32 -1.0, %v1013_v32 }
  0xdf   : > { %1108 = vst [vmem:[%s2046_s17 + $0x168] sm:$0xff] %v1444_v31 }
  0xe0   : > { %v1716_v33 = vpop.eup %1715  ;;  %1109 = vst [vmem:[%s2046_s17 + $0x170] sm:$0xff] %v1445_v34 }
  0xe1   : > { %v1014_v36 = vmul.f32 2.0, %v1716_v33 }
  0xe3   : > { %v1446_v37 = vadd.f32 -1.0, %v1014_v36 }
  0xe5   : > { %1110 = vst [vmem:[%s2046_s17 + $0x178] sm:$0xff] %v1446_v37 }
  0xe6   : > { %1745 = shalt.err (!%p1742_p3)
}
  0xe7   : > { %s1746_s14 = scalar_lea.hbm %s2345_s27, 6144  ;;  %s1750_s11 = scalar_lea.hbm %s2402_s4, 12288 }
  0xe8   : > { %p1747_p5 = scmp.ne.s32.totalorder %s2345_s27, %s1746_s14  ;;  %p1751_p9 = scmp.lt.u32.totalorder %s2345_s27, %s2402_s4 }
  0xe9   : > { %p1752_p12 = scmp.lt.u32.totalorder %s1750_s11, %s1746_s14  ;;  %p1754_p11 = scmp.lt.u32.totalorder %s1746_s14, %s2345_s27 }
  0xea   : > { %p1748_p6 = pnand %p1747_p5, %p1891_p4 }
  0xeb   : > { %p1753_p10 = por %p1752_p12, %p1751_p9 }
  0xec   : > { %p1749_p7 = pneg %p1748_p6 }
  0xed   : > { %p1755_p13 = por %p1754_p11, %p1753_p10 }
  0xef   : > { %p1756_p0 = pnand %p1755_p13, %p1749_p7 }
  0xf1   : > { %1759 = shalt.err (!%p1756_p0)
}
  0xf2   : > { %s1819_s15 = smov 256   ;;  %s1820_s24 = smov 16  }
  0xf3   : > { %1460 = dma.vmem_to_hbm [thread:$0]  (%p1891_p4), %s2347_s16, 6144, %s2345_s27, %s2352_s21, %s1819_s15, %s1819_s15, %s1820_s24  }
  0xf4 PF: > { %p1472_p1 = scmp.ge.s32.totalorder %s1814_s23, 2  ;;  %s1221_s25 = sand.u32 1, %s1794_s18  }
  0xf5   : > { %s1222_s29 = scalar_lea.sflag [#allocation3], %s1221_s25 }
  0xf6   : > { %p1467_p2 = pnand %p1472_p1, %p1898_p8 }
  0xf8   : > { %1789 = dma.done.wait (!%p1467_p2), %s1222_s29, 6144  }
  0xf9   : > { %1791 = vsyncadd (!%p1467_p2), %s1222_s29, 4294961152  ;;  %s20_s23 = sadd.s32 1, %s1814_s23   ;;  %s2416_s18 = smov %s1798_s19 }
  0xfa   : > { %p17_p3 = scmp.ge.s32.totalorder %s20_s23, 4   ;;  %s2417_s19 = smov %s1802_s20 }
  0xfb   : > { %s2418_s20 = smov %s1904_s6  ;;  %s2419_s21 = smov %s1810_s22 }
  0xfc   : > { %s2420_s22 = smov %s2422_s26  ;;  %19 = sbr.rel (!%p17_p3) target bundleno = 5 (0x5), region = 94 }
 0x103   :  { %1240 = vsyncpa [#allocation3], 1 }
 0x104   :  { %1242 = vsyncpa [#allocation3 + $0x1], 1 }
 0x105   :  { %1243 = vsyncpa [#allocation4], 1 }
 0x106   :  { %1245 = vsyncpa [#allocation4 + $0x1], 1 }

</bundles_post_ra>
